<compile_context>
chip_gen: v7x
topology: tpu7x:2x2x1
jax: 0.10.0
libtpu: 0.0.40
codegen_flags: <defaults>
</compile_context>

<pallas_src>
import functools

import jax
import jax.numpy as jnp
import numpy as np
from jax.experimental import pallas as pl
from jax.experimental.pallas import tpu as pltpu


def _round_up(x, m):
    return ((x + m - 1) // m) * m


def _pad2d(x, rows, cols):
    r, c = x.shape
    if r == rows and c == cols:
        return x
    return jnp.pad(x, ((0, rows - r), (0, cols - c)))


def _fused_vmem_limit(tm, in_pad, tn, w_itemsize, has_bias):
    """2x double-buffered input/output tiles + scratch + headroom, clamped to
    the smallest physical VMEM across generations (v7x: 64 MiB)."""
    f32 = 4
    in_bytes = (tm * in_pad * f32                 # Sin block
                + 2 * tm * in_pad * f32           # P0, Q0
                + 2 * tm * tn * f32               # R0, S0
                + in_pad * tn * w_itemsize)       # weight band
    if has_bias:
        in_bytes += tn * f32
    out_bytes = (2 * tm * tn * f32                # U_seq, S_seq blocks
                 + 2 * tm * in_pad * f32          # P_T, Q_T
                 + 2 * tm * tn * f32)             # R_T, S_T
    scratch = 2 * tm * in_pad * f32 + 2 * tm * tn * f32
    need = 2 * (in_bytes + out_bytes) + scratch
    return int(min(max(need + (8 << 20), 32 << 20), 64 << 20))


def _lif_fused_kernel(*refs, alpha, beta, alpharp, wrp, tau_m, tau_s,
                      has_bias, compute_dtype):
    if has_bias:
        (sin_ref, p0_ref, q0_ref, r0_ref, s0_ref, w_ref, b_ref,
         u_seq_ref, s_seq_ref, p_out_ref, q_out_ref, r_out_ref, s_out_ref,
         p_scr, q_scr, r_scr, s_scr) = refs
    else:
        (sin_ref, p0_ref, q0_ref, r0_ref, s0_ref, w_ref,
         u_seq_ref, s_seq_ref, p_out_ref, q_out_ref, r_out_ref, s_out_ref,
         p_scr, q_scr, r_scr, s_scr) = refs
        b_ref = None

    t = pl.program_id(2)

    # Load the initial state for this (j, i) strip into VMEM scratch.
    @pl.when(t == 0)
    def _():
        p_scr[...] = p0_ref[...]
        q_scr[...] = q0_ref[...]
        r_scr[...] = r0_ref[...]
        s_scr[...] = s0_ref[...]

    q_prev = q_scr[...]
    p_new = alpha * p_scr[...] + tau_m * q_prev            # P_t  (f32, VPU)
    q_new = beta * q_prev + tau_s * sin_ref[0]              # Q_t
    r_new = alpharp * r_scr[...] - wrp * s_scr[...]         # R_t

    # Membrane potential: bf16 (or f32) operands, f32 MXU accumulation.
    u = jnp.dot(p_new.astype(compute_dtype), w_ref[...],
                preferred_element_type=jnp.float32)
    u = u + r_new
    if has_bias:
        u = u + b_ref[...]                                  # broadcast [1, tn]
    s_new = (u >= 0.0).astype(jnp.float32)                  # SmoothStep fwd

    u_seq_ref[0] = u                                        # lane-dense stores
    s_seq_ref[0] = s_new

    # Carry state to the next timestep (stays in VMEM).
    p_scr[...] = p_new
    q_scr[...] = q_new
    r_scr[...] = r_new
    s_scr[...] = s_new

    # Only the last timestep materialises the carried state back to HBM.
    @pl.when(t == pl.num_programs(2) - 1)
    def _():
        p_out_ref[...] = p_scr[...]
        q_out_ref[...] = q_scr[...]
        r_out_ref[...] = r_scr[...]
        s_out_ref[...] = s_scr[...]


def lif_linear_rollout_padded(sin_seq_pad, p_pad, q_pad, r_pad, s_pad,
                              w_pad, b_pad, *, alpha, beta, alpharp, wrp,
                              tm, tn, compute_dtype,
                              vmem_limit_bytes=None):
    """T-step LIF rollout on pre-padded arrays.

    sin_seq_pad : [T, B_pad, IN_pad]   f32 input spikes
    p_pad,q_pad : [B_pad, IN_pad]      f32 traces at t = -1
    r_pad,s_pad : [B_pad, OUT_pad]     f32 refractory / spikes at t = -1
    w_pad       : [IN_pad, OUT_pad]    transposed weight, compute_dtype
    b_pad       : [1, OUT_pad] f32 or None
    returns (U_seq, S_seq, P_T, Q_T, R_T, S_T), all padded.
    """
    T, B_pad, IN_pad = sin_seq_pad.shape
    OUT_pad = w_pad.shape[1]
    n_i, n_j = B_pad // tm, OUT_pad // tn
    has_bias = b_pad is not None
    tau_m = 1.0 / (1.0 - alpha)
    tau_s = 1.0 / (1.0 - beta)
    f32 = jnp.float32

    in_specs = [
        pl.BlockSpec((1, tm, IN_pad), lambda j, i, t: (t, i, 0)),   # Sin_t
        pl.BlockSpec((tm, IN_pad),    lambda j, i, t: (i, 0)),      # P_{-1}
        pl.BlockSpec((tm, IN_pad),    lambda j, i, t: (i, 0)),      # Q_{-1}
        pl.BlockSpec((tm, tn),        lambda j, i, t: (i, j)),      # R_{-1}
        pl.BlockSpec((tm, tn),        lambda j, i, t: (i, j)),      # S_{-1}
        pl.BlockSpec((IN_pad, tn),    lambda j, i, t: (0, j)),      # W band
    ]
    args = [sin_seq_pad, p_pad, q_pad, r_pad, s_pad, w_pad]
    if has_bias:
        in_specs.append(pl.BlockSpec((1, tn), lambda j, i, t: (0, j)))
        args.append(b_pad)

    out_shape = (
        jax.ShapeDtypeStruct((T, B_pad, OUT_pad), f32),   # U_seq
        jax.ShapeDtypeStruct((T, B_pad, OUT_pad), f32),   # S_seq
        jax.ShapeDtypeStruct((B_pad, IN_pad), f32),       # P_T
        jax.ShapeDtypeStruct((B_pad, IN_pad), f32),       # Q_T
        jax.ShapeDtypeStruct((B_pad, OUT_pad), f32),      # R_T
        jax.ShapeDtypeStruct((B_pad, OUT_pad), f32),      # S_T
    )
    out_specs = [
        pl.BlockSpec((1, tm, tn),  lambda j, i, t: (t, i, j)),
        pl.BlockSpec((1, tm, tn),  lambda j, i, t: (t, i, j)),
        pl.BlockSpec((tm, IN_pad), lambda j, i, t: (i, 0)),
        pl.BlockSpec((tm, IN_pad), lambda j, i, t: (i, 0)),
        pl.BlockSpec((tm, tn),     lambda j, i, t: (i, j)),
        pl.BlockSpec((tm, tn),     lambda j, i, t: (i, j)),
    ]
    scratch_shapes = [
        pltpu.VMEM((tm, IN_pad), f32),   # P carry
        pltpu.VMEM((tm, IN_pad), f32),   # Q carry
        pltpu.VMEM((tm, tn), f32),       # R carry
        pltpu.VMEM((tm, tn), f32),       # S carry
    ]

    if vmem_limit_bytes is None:
        vmem_limit_bytes = _fused_vmem_limit(
            tm, IN_pad, tn, jnp.dtype(w_pad.dtype).itemsize, has_bias)

    kernel = functools.partial(
        _lif_fused_kernel, alpha=float(alpha), beta=float(beta),
        alpharp=float(alpharp), wrp=float(wrp),
        tau_m=float(tau_m), tau_s=float(tau_s),
        has_bias=has_bias, compute_dtype=compute_dtype)

    return pl.pallas_call(
        kernel,
        out_shape=out_shape,
        grid_spec=pltpu.PrefetchScalarGridSpec(
            num_scalar_prefetch=0,
            grid=(n_j, n_i, T),
            in_specs=in_specs,
            out_specs=out_specs,
            scratch_shapes=scratch_shapes,
        ),
        compiler_params=pltpu.CompilerParams(
            dimension_semantics=("parallel", "parallel", "arbitrary"),
            vmem_limit_bytes=vmem_limit_bytes,
        ),
    )(*args)


class LIFLayerPallas:
    """JAX/Pallas port of decolle LIFLayer (forward pass, Linear base layer)."""

    def __init__(self, in_features, out_features, key, *,
                 alpha=0.9, alpharp=0.65, wrp=1.0, beta=0.85,
                 bias=True, do_detach=True,
                 compute_dtype=jnp.bfloat16,      # bf16 MXU path by default
                 block_b=128, block_out=512):
        self.in_features = in_features
        self.out_features = out_features
        self.alpha = float(alpha)
        self.beta = float(beta)
        self.alpharp = float(alpharp)
        self.wrp = float(wrp)
        self.tau_m = 1.0 / (1.0 - self.alpha)
        self.tau_s = 1.0 / (1.0 - self.beta)
        self.do_detach = do_detach   # no-op: forward-only port, no autograd graph
        self.compute_dtype = compute_dtype
        self.block_b = _round_up(int(block_b), 8)
        block_out = _round_up(int(block_out), 128)

        # Lane-dense padded geometry, fixed at construction.
        self.IN_pad = _round_up(in_features, 128)
        out_pad = _round_up(out_features, 128)
        self.tn = out_pad if out_pad <= block_out else block_out
        self.OUT_pad = _round_up(out_pad, self.tn)

        k_w, k_b = jax.random.split(key)
        # Small deterministic init (decolle re-inits weights elsewhere).
        weight = 0.05 * jax.random.normal(
            k_w, (out_features, in_features), dtype=jnp.float32)
        self.weight = weight                      # PyTorch [OUT, IN] convention
        # Pre-transposed, pre-padded, pre-cast ONCE (no per-step pad/cast).
        self.weight_pad = _pad2d(weight.T, self.IN_pad, self.OUT_pad
                                 ).astype(compute_dtype)
        if bias:
            b = 0.1 * jax.random.normal(k_b, (out_features,), dtype=jnp.float32)
            self.bias = b
            self.bias_pad = _pad2d(b.reshape(1, -1), 1, self.OUT_pad)
        else:
            self.bias = None
            self.bias_pad = None

        self.state = None
        self._B = None

    # --- state management -------------------------------------------------
    def init_state(self, sin_t):
        B = int(sin_t.shape[0])
        self._B = B
        b_pad = _round_up(B, 8)
        self.tm = b_pad if b_pad <= self.block_b else self.block_b
        self.B_pad = _round_up(b_pad, self.tm)
        z_in = jnp.zeros((self.B_pad, self.IN_pad), jnp.float32)
        z_out = jnp.zeros((self.B_pad, self.OUT_pad), jnp.float32)
        # State is kept PERSISTENTLY padded across calls.
        self.state = dict(P=z_in, Q=z_in, R=z_out, S=z_out)

    def _pad_sin(self, x):                       # x: [T, B, IN]
        T, B, IN = x.shape
        return jnp.pad(x.astype(jnp.float32),
                       ((0, 0), (0, self.B_pad - B), (0, self.IN_pad - IN)))

    def _rollout(self, sin_pad):
        st = self.state
        return lif_linear_rollout_padded(
            sin_pad, st["P"], st["Q"], st["R"], st["S"],
            self.weight_pad, self.bias_pad,
            alpha=self.alpha, beta=self.beta,
            alpharp=self.alpharp, wrp=self.wrp,
            tm=self.tm, tn=self.tn, compute_dtype=self.compute_dtype)

    # --- forward ------------------------------------------------------------
    def __call__(self, sin_t):
        """One timestep; sin_t: [B, IN] -> (S_t, U_t) each [B, OUT]."""
        if self.state is None:
            self.init_state(sin_t)
        u_seq, s_seq, p, q, r, s = self._rollout(self._pad_sin(sin_t[None]))
        self.state = dict(P=p, Q=q, R=r, S=s)
        B, OUT = self._B, self.out_features
        return s_seq[0, :B, :OUT], u_seq[0, :B, :OUT]

    def forward_sequence(self, sin_seq):
        """Fused T-step rollout; sin_seq: [T, B, IN] -> (S_seq, U_seq)."""
        if self.state is None:
            self.init_state(sin_seq[0])
        u_seq, s_seq, p, q, r, s = self._rollout(self._pad_sin(sin_seq))
        self.state = dict(P=p, Q=q, R=r, S=s)
        B, OUT = self._B, self.out_features
        return s_seq[:, :B, :OUT], u_seq[:, :B, :OUT]


if __name__ == "__main__":
    key = jax.random.PRNGKey(0)
    k_x, k_m = jax.random.split(key)

    B, IN, OUT, T = 16, 96, 200, 5
    sin_seq = (jax.random.uniform(k_x, (T, B, IN)) < 0.3).astype(jnp.float32)

    # f32 compute path for the exact reference check; small blocks so the grid
    # has 2 batch tiles x 2 OUT bands (exercises tiling + both parallel axes).
    def make_f32_layer():
        return LIFLayerPallas(IN, OUT, k_m, bias=True,
                              compute_dtype=jnp.float32,
                              block_b=8, block_out=128)

    # Per-timestep path (fused kernel with T == 1).
    layer_step = make_f32_layer()
    step_out = []
    for t in range(T):
        s_t, u_t = layer_step(sin_seq[t])
        step_out.append((np.asarray(s_t), np.asarray(u_t)))
    jax.block_until_ready(layer_step.state["P"])

    # Fused T-step rollout path (fresh layer, same weights).
    layer_seq = make_f32_layer()
    S_seq, U_seq = layer_seq.forward_sequence(sin_seq)
    jax.block_until_ready(U_seq)
    S_seq = np.asarray(S_seq)
    U_seq = np.asarray(U_seq)

    # Per-step and fused paths must agree.
    for t in range(T):
        assert np.allclose(step_out[t][1], U_seq[t], atol=1e-5, rtol=1e-5), \
            f"step/fused U mismatch at t={t}"
        decided = np.abs(U_seq[t]) > 1e-6
        assert np.array_equal(step_out[t][0][decided], S_seq[t][decided]), \
            f"step/fused S mismatch at t={t}"

    # float64 reference. The refractory trace is propagated with the KERNEL's
    # spike train so a knife-edge threshold flip cannot cascade into later
    # comparisons; spikes are checked independently wherever |U| is decided.
    alpha, beta = layer_seq.alpha, layer_seq.beta
    alpharp, wrp = layer_seq.alpharp, layer_seq.wrp
    tau_m, tau_s = 1.0 / (1.0 - alpha), 1.0 / (1.0 - beta)
    W = np.asarray(layer_seq.weight, np.float64)
    b = np.asarray(layer_seq.bias, np.float64)
    sin_np = np.asarray(sin_seq, np.float64)
    P = np.zeros((B, IN)); Q = np.zeros((B, IN))
    R = np.zeros((B, OUT)); S_prev = np.zeros((B, OUT))
    for t in range(T):
        Qn = beta * Q + tau_s * sin_np[t]
        Pn = alpha * P + tau_m * Q
        Rn = alpharp * R - wrp * S_prev
        U_ref = Pn @ W.T + b + Rn
        assert np.allclose(U_seq[t], U_ref, atol=5e-3, rtol=1e-4), \
            f"U mismatch vs numpy at t={t}"
        decided = np.abs(U_ref) > 1e-2
        assert np.array_equal(S_seq[t][decided],
                              (U_ref >= 0).astype(np.float64)[decided]), \
            f"S mismatch vs numpy at t={t}"
        P, Q, R = Pn, Qn, Rn
        S_prev = S_seq[t].astype(np.float64)     # propagate kernel spikes
    assert np.allclose(np.asarray(layer_seq.state["P"])[:B, :IN], P,
                       atol=1e-2, rtol=1e-4)
    assert np.allclose(np.asarray(layer_seq.state["Q"])[:B, :IN], Q,
                       atol=1e-2, rtol=1e-4)
    assert np.allclose(np.asarray(layer_seq.state["R"])[:B, :OUT], R,
                       atol=1e-2, rtol=1e-4)

    # bf16 production path (default): compile + run smoke test. Threshold
    # decisions are bf16-sensitive, so only check shapes / finiteness here.
    layer_bf16 = LIFLayerPallas(IN, OUT, k_m, bias=True)
    Sb, Ub = layer_bf16.forward_sequence(sin_seq)
    jax.block_until_ready(Ub)
    assert Sb.shape == (T, B, OUT) and Ub.shape == (T, B, OUT)
    assert np.all(np.isfinite(np.asarray(Ub)))

    print("KERNEL_OK")
</pallas_src>

<mosaic_0001>
module attributes {stable_mosaic.version = 11 : i64} {
  func.func @_lif_fused_kernel(%arg0: i32, %arg1: i32, %arg2: i32, %arg3: memref<1x8x128xf32, #tpu.memory_space<vmem>>, %arg4: memref<8x128xf32, #tpu.memory_space<vmem>>, %arg5: memref<8x128xf32, #tpu.memory_space<vmem>>, %arg6: memref<8x128xf32, #tpu.memory_space<vmem>>, %arg7: memref<8x128xf32, #tpu.memory_space<vmem>>, %arg8: memref<128x128xf32, #tpu.memory_space<vmem>>, %arg9: memref<1x128xf32, #tpu.memory_space<vmem>>, %arg10: memref<1x8x128xf32, #tpu.memory_space<vmem>>, %arg11: memref<1x8x128xf32, #tpu.memory_space<vmem>>, %arg12: memref<8x128xf32, #tpu.memory_space<vmem>>, %arg13: memref<8x128xf32, #tpu.memory_space<vmem>>, %arg14: memref<8x128xf32, #tpu.memory_space<vmem>>, %arg15: memref<8x128xf32, #tpu.memory_space<vmem>>, %arg16: memref<8x128xf32, #tpu.memory_space<vmem>>, %arg17: memref<8x128xf32, #tpu.memory_space<vmem>>, %arg18: memref<8x128xf32, #tpu.memory_space<vmem>>, %arg19: memref<8x128xf32, #tpu.memory_space<vmem>>) attributes {dimension_semantics = [#tpu.dimension_semantics<parallel>, #tpu.dimension_semantics<parallel>, #tpu.dimension_semantics<arbitrary>], iteration_bounds = array<i64: 2, 2, 1>, scalar_prefetch = 0 : i64, scratch_operands = 4 : i64, tpu.core_type = #tpu.core_type<tc>, window_params = [{transform_indices = @transform_0, window_bounds = array<i64: 1, 8, 128>}, {transform_indices = @transform_1, window_bounds = array<i64: 8, 128>}, {transform_indices = @transform_2, window_bounds = array<i64: 8, 128>}, {transform_indices = @transform_3, window_bounds = array<i64: 8, 128>}, {transform_indices = @transform_4, window_bounds = array<i64: 8, 128>}, {transform_indices = @transform_5, window_bounds = array<i64: 128, 128>}, {transform_indices = @transform_6, window_bounds = array<i64: 1, 128>}, {transform_indices = @transform_7, window_bounds = array<i64: 1, 8, 128>}, {transform_indices = @transform_8, window_bounds = array<i64: 1, 8, 128>}, {transform_indices = @transform_9, window_bounds = array<i64: 8, 128>}, {transform_indices = @transform_10, window_bounds = array<i64: 8, 128>}, {transform_indices = @transform_11, window_bounds = array<i64: 8, 128>}, {transform_indices = @transform_12, window_bounds = array<i64: 8, 128>}]} {
    %c0_i32 = arith.constant 0 : i32
    %0 = arith.cmpi eq, %arg2, %c0_i32 : i32
    %1 = arith.extui %0 : i1 to i32
    %c0_i32_0 = arith.constant 0 : i32
    %2 = arith.cmpi ne, %1, %c0_i32_0 : i32
    scf.if %2 {
      %c0_38 = arith.constant 0 : index
      %c0_39 = arith.constant 0 : index
      %47 = vector.load %arg4[%c0_38, %c0_39] : memref<8x128xf32, #tpu.memory_space<vmem>>, vector<8x128xf32>
      %c0_40 = arith.constant 0 : index
      %c0_41 = arith.constant 0 : index
      %48 = vector.load %arg16[%c0_40, %c0_41] : memref<8x128xf32, #tpu.memory_space<vmem>>, vector<8x128xf32>
      tpu.vector_store %arg16[%c0_40, %c0_41], %47 {strides = array<i32>} : memref<8x128xf32, #tpu.memory_space<vmem>>, vector<8x128xf32>,
      %c0_42 = arith.constant 0 : index
      %c0_43 = arith.constant 0 : index
      %49 = vector.load %arg5[%c0_42, %c0_43] : memref<8x128xf32, #tpu.memory_space<vmem>>, vector<8x128xf32>
      %c0_44 = arith.constant 0 : index
      %c0_45 = arith.constant 0 : index
      %50 = vector.load %arg17[%c0_44, %c0_45] : memref<8x128xf32, #tpu.memory_space<vmem>>, vector<8x128xf32>
      tpu.vector_store %arg17[%c0_44, %c0_45], %49 {strides = array<i32>} : memref<8x128xf32, #tpu.memory_space<vmem>>, vector<8x128xf32>,
      %c0_46 = arith.constant 0 : index
      %c0_47 = arith.constant 0 : index
      %51 = vector.load %arg6[%c0_46, %c0_47] : memref<8x128xf32, #tpu.memory_space<vmem>>, vector<8x128xf32>
      %c0_48 = arith.constant 0 : index
      %c0_49 = arith.constant 0 : index
      %52 = vector.load %arg18[%c0_48, %c0_49] : memref<8x128xf32, #tpu.memory_space<vmem>>, vector<8x128xf32>
      tpu.vector_store %arg18[%c0_48, %c0_49], %51 {strides = array<i32>} : memref<8x128xf32, #tpu.memory_space<vmem>>, vector<8x128xf32>,
      %c0_50 = arith.constant 0 : index
      %c0_51 = arith.constant 0 : index
      %53 = vector.load %arg7[%c0_50, %c0_51] : memref<8x128xf32, #tpu.memory_space<vmem>>, vector<8x128xf32>
      %c0_52 = arith.constant 0 : index
      %c0_53 = arith.constant 0 : index
      %54 = vector.load %arg19[%c0_52, %c0_53] : memref<8x128xf32, #tpu.memory_space<vmem>>, vector<8x128xf32>
      tpu.vector_store %arg19[%c0_52, %c0_53], %53 {strides = array<i32>} : memref<8x128xf32, #tpu.memory_space<vmem>>, vector<8x128xf32>,
    } else {
    }
    %c0 = arith.constant 0 : index
    %c0_1 = arith.constant 0 : index
    %3 = vector.load %arg17[%c0, %c0_1] : memref<8x128xf32, #tpu.memory_space<vmem>>, vector<8x128xf32>
    %c0_2 = arith.constant 0 : index
    %c0_3 = arith.constant 0 : index
    %4 = vector.load %arg16[%c0_2, %c0_3] : memref<8x128xf32, #tpu.memory_space<vmem>>, vector<8x128xf32>
    %cst = arith.constant 0.899999976 : f32
    %5 = vector.broadcast %cst : f32 to vector<8x128xf32>
    %6 = arith.mulf %5, %4 : vector<8x128xf32>
    %cst_4 = arith.constant 1.000000e+01 : f32
    %7 = vector.broadcast %cst_4 : f32 to vector<8x128xf32>
    %8 = arith.mulf %7, %3 : vector<8x128xf32>
    %9 = arith.addf %6, %8 : vector<8x128xf32>
    %cst_5 = arith.constant 8.500000e-01 : f32
    %10 = vector.broadcast %cst_5 : f32 to vector<8x128xf32>
    %11 = arith.mulf %10, %3 : vector<8x128xf32>
    %c0_6 = arith.constant 0 : index
    %c0_7 = arith.constant 0 : index
    %c0_8 = arith.constant 0 : index
    %12 = vector.load %arg3[%c0_6, %c0_7, %c0_8] : memref<1x8x128xf32, #tpu.memory_space<vmem>>, vector<1x8x128xf32>
    %13 = vector.shape_cast %12 : vector<1x8x128xf32> to vector<8x128xf32>
    %cst_9 = arith.constant 6.66666651 : f32
    %14 = vector.broadcast %cst_9 : f32 to vector<8x128xf32>
    %15 = arith.mulf %14, %13 : vector<8x128xf32>
    %16 = arith.addf %11, %15 : vector<8x128xf32>
    %c0_10 = arith.constant 0 : index
    %c0_11 = arith.constant 0 : index
    %17 = vector.load %arg18[%c0_10, %c0_11] : memref<8x128xf32, #tpu.memory_space<vmem>>, vector<8x128xf32>
    %cst_12 = arith.constant 6.500000e-01 : f32
    %18 = vector.broadcast %cst_12 : f32 to vector<8x128xf32>
    %19 = arith.mulf %18, %17 : vector<8x128xf32>
    %c0_13 = arith.constant 0 : index
    %c0_14 = arith.constant 0 : index
    %20 = vector.load %arg19[%c0_13, %c0_14] : memref<8x128xf32, #tpu.memory_space<vmem>>, vector<8x128xf32>
    %cst_15 = arith.constant 1.000000e+00 : f32
    %21 = vector.broadcast %cst_15 : f32 to vector<8x128xf32>
    %22 = arith.mulf %21, %20 : vector<8x128xf32>
    %23 = arith.subf %19, %22 : vector<8x128xf32>
    %c0_16 = arith.constant 0 : index
    %c0_17 = arith.constant 0 : index
    %24 = vector.load %arg8[%c0_16, %c0_17] : memref<128x128xf32, #tpu.memory_space<vmem>>, vector<128x128xf32>
    %cst_18 = arith.constant dense<0.000000e+00> : vector<8x128xf32>
    %25 = tpu.matmul %9, %24, %cst_18 {dimension_numbers = #tpu.dot_dimension_numbers<[1], [0], [0], [1], [0, 0, 1, 1], [], []>} : vector<8x128xf32>, vector<128x128xf32>, vector<8x128xf32> -> vector<8x128xf32>
    %26 = arith.addf %25, %23 : vector<8x128xf32>
    %c0_19 = arith.constant 0 : index
    %c0_20 = arith.constant 0 : index
    %27 = vector.load %arg9[%c0_19, %c0_20] : memref<1x128xf32, #tpu.memory_space<vmem>>, vector<1x128xf32>
    %28 = vector.broadcast %27 : vector<1x128xf32> to vector<8x128xf32>
    %29 = arith.addf %26, %28 : vector<8x128xf32>
    %cst_21 = arith.constant 0.000000e+00 : f32
    %30 = vector.broadcast %cst_21 : f32 to vector<8x128xf32>
    %31 = arith.cmpf oge, %29, %30 : vector<8x128xf32>
    %32 = arith.extui %31 : vector<8x128xi1> to vector<8x128xi32>
    %33 = arith.sitofp %32 : vector<8x128xi32> to vector<8x128xf32>
    %c0_22 = arith.constant 0 : index
    %c0_23 = arith.constant 0 : index
    %c0_24 = arith.constant 0 : index
    %34 = vector.load %arg10[%c0_22, %c0_23, %c0_24] : memref<1x8x128xf32, #tpu.memory_space<vmem>>, vector<1x8x128xf32>
    %35 = vector.shape_cast %34 : vector<1x8x128xf32> to vector<8x128xf32>
    %36 = vector.shape_cast %29 : vector<8x128xf32> to vector<1x8x128xf32>
    tpu.vector_store %arg10[%c0_22, %c0_23, %c0_24], %36 {strides = array<i32>} : memref<1x8x128xf32, #tpu.memory_space<vmem>>, vector<1x8x128xf32>,
    %c0_25 = arith.constant 0 : index
    %c0_26 = arith.constant 0 : index
    %c0_27 = arith.constant 0 : index
    %37 = vector.load %arg11[%c0_25, %c0_26, %c0_27] : memref<1x8x128xf32, #tpu.memory_space<vmem>>, vector<1x8x128xf32>
    %38 = vector.shape_cast %37 : vector<1x8x128xf32> to vector<8x128xf32>
    %39 = vector.shape_cast %33 : vector<8x128xf32> to vector<1x8x128xf32>
    tpu.vector_store %arg11[%c0_25, %c0_26, %c0_27], %39 {strides = array<i32>} : memref<1x8x128xf32, #tpu.memory_space<vmem>>, vector<1x8x128xf32>,
    %c0_28 = arith.constant 0 : index
    %c0_29 = arith.constant 0 : index
    %40 = vector.load %arg16[%c0_28, %c0_29] : memref<8x128xf32, #tpu.memory_space<vmem>>, vector<8x128xf32>
    tpu.vector_store %arg16[%c0_28, %c0_29], %9 {strides = array<i32>} : memref<8x128xf32, #tpu.memory_space<vmem>>, vector<8x128xf32>,
    %c0_30 = arith.constant 0 : index
    %c0_31 = arith.constant 0 : index
    %41 = vector.load %arg17[%c0_30, %c0_31] : memref<8x128xf32, #tpu.memory_space<vmem>>, vector<8x128xf32>
    tpu.vector_store %arg17[%c0_30, %c0_31], %16 {strides = array<i32>} : memref<8x128xf32, #tpu.memory_space<vmem>>, vector<8x128xf32>,
    %c0_32 = arith.constant 0 : index
    %c0_33 = arith.constant 0 : index
    %42 = vector.load %arg18[%c0_32, %c0_33] : memref<8x128xf32, #tpu.memory_space<vmem>>, vector<8x128xf32>
    tpu.vector_store %arg18[%c0_32, %c0_33], %23 {strides = array<i32>} : memref<8x128xf32, #tpu.memory_space<vmem>>, vector<8x128xf32>,
    %c0_34 = arith.constant 0 : index
    %c0_35 = arith.constant 0 : index
    %43 = vector.load %arg19[%c0_34, %c0_35] : memref<8x128xf32, #tpu.memory_space<vmem>>, vector<8x128xf32>
    tpu.vector_store %arg19[%c0_34, %c0_35], %33 {strides = array<i32>} : memref<8x128xf32, #tpu.memory_space<vmem>>, vector<8x128xf32>,
    %c0_i32_36 = arith.constant 0 : i32
    %44 = arith.cmpi eq, %arg2, %c0_i32_36 : i32
    %45 = arith.extui %44 : i1 to i32
    %c0_i32_37 = arith.constant 0 : i32
    %46 = arith.cmpi ne, %45, %c0_i32_37 : i32
    scf.if %46 {
      %c0_38 = arith.constant 0 : index
      %c0_39 = arith.constant 0 : index
      %47 = vector.load %arg16[%c0_38, %c0_39] : memref<8x128xf32, #tpu.memory_space<vmem>>, vector<8x128xf32>
      %c0_40 = arith.constant 0 : index
      %c0_41 = arith.constant 0 : index
      %48 = vector.load %arg12[%c0_40, %c0_41] : memref<8x128xf32, #tpu.memory_space<vmem>>, vector<8x128xf32>
      tpu.vector_store %arg12[%c0_40, %c0_41], %47 {strides = array<i32>} : memref<8x128xf32, #tpu.memory_space<vmem>>, vector<8x128xf32>,
      %c0_42 = arith.constant 0 : index
      %c0_43 = arith.constant 0 : index
      %49 = vector.load %arg17[%c0_42, %c0_43] : memref<8x128xf32, #tpu.memory_space<vmem>>, vector<8x128xf32>
      %c0_44 = arith.constant 0 : index
      %c0_45 = arith.constant 0 : index
      %50 = vector.load %arg13[%c0_44, %c0_45] : memref<8x128xf32, #tpu.memory_space<vmem>>, vector<8x128xf32>
      tpu.vector_store %arg13[%c0_44, %c0_45], %49 {strides = array<i32>} : memref<8x128xf32, #tpu.memory_space<vmem>>, vector<8x128xf32>,
      %c0_46 = arith.constant 0 : index
      %c0_47 = arith.constant 0 : index
      %51 = vector.load %arg18[%c0_46, %c0_47] : memref<8x128xf32, #tpu.memory_space<vmem>>, vector<8x128xf32>
      %c0_48 = arith.constant 0 : index
      %c0_49 = arith.constant 0 : index
      %52 = vector.load %arg14[%c0_48, %c0_49] : memref<8x128xf32, #tpu.memory_space<vmem>>, vector<8x128xf32>
      tpu.vector_store %arg14[%c0_48, %c0_49], %51 {strides = array<i32>} : memref<8x128xf32, #tpu.memory_space<vmem>>, vector<8x128xf32>,
      %c0_50 = arith.constant 0 : index
      %c0_51 = arith.constant 0 : index
      %53 = vector.load %arg19[%c0_50, %c0_51] : memref<8x128xf32, #tpu.memory_space<vmem>>, vector<8x128xf32>
      %c0_52 = arith.constant 0 : index
      %c0_53 = arith.constant 0 : index
      %54 = vector.load %arg15[%c0_52, %c0_53] : memref<8x128xf32, #tpu.memory_space<vmem>>, vector<8x128xf32>
      tpu.vector_store %arg15[%c0_52, %c0_53], %53 {strides = array<i32>} : memref<8x128xf32, #tpu.memory_space<vmem>>, vector<8x128xf32>,
    } else {
    }
    return
  }
  func.func @transform_0(%arg0: i32, %arg1: i32, %arg2: i32) -> (i32, i32, i32) {
    %c0_i32 = arith.constant 0 : i32
    %c0_i32_0 = arith.constant 0 : i32
    return %arg2, %arg1, %c0_i32 : i32, i32, i32
  }
  func.func @transform_1(%arg0: i32, %arg1: i32, %arg2: i32) -> (i32, i32) {
    %c0_i32 = arith.constant 0 : i32
    %c0_i32_0 = arith.constant 0 : i32
    return %arg1, %c0_i32 : i32, i32
  }
  func.func @transform_2(%arg0: i32, %arg1: i32, %arg2: i32) -> (i32, i32) {
    %c0_i32 = arith.constant 0 : i32
    %c0_i32_0 = arith.constant 0 : i32
    return %arg1, %c0_i32 : i32, i32
  }
  func.func @transform_3(%arg0: i32, %arg1: i32, %arg2: i32) -> (i32, i32) {
    %c0_i32 = arith.constant 0 : i32
    return %arg1, %arg0 : i32, i32
  }
  func.func @transform_4(%arg0: i32, %arg1: i32, %arg2: i32) -> (i32, i32) {
    %c0_i32 = arith.constant 0 : i32
    return %arg1, %arg0 : i32, i32
  }
  func.func @transform_5(%arg0: i32, %arg1: i32, %arg2: i32) -> (i32, i32) {
    %c0_i32 = arith.constant 0 : i32
    %c0_i32_0 = arith.constant 0 : i32
    return %c0_i32, %arg0 : i32, i32
  }
  func.func @transform_6(%arg0: i32, %arg1: i32, %arg2: i32) -> (i32, i32) {
    %c0_i32 = arith.constant 0 : i32
    %c0_i32_0 = arith.constant 0 : i32
    return %c0_i32, %arg0 : i32, i32
  }
  func.func @transform_7(%arg0: i32, %arg1: i32, %arg2: i32) -> (i32, i32, i32) {
    %c0_i32 = arith.constant 0 : i32
    return %arg2, %arg1, %arg0 : i32, i32, i32
  }
  func.func @transform_8(%arg0: i32, %arg1: i32, %arg2: i32) -> (i32, i32, i32) {
    %c0_i32 = arith.constant 0 : i32
    return %arg2, %arg1, %arg0 : i32, i32, i32
  }
  func.func @transform_9(%arg0: i32, %arg1: i32, %arg2: i32) -> (i32, i32) {
    %c0_i32 = arith.constant 0 : i32
    %c0_i32_0 = arith.constant 0 : i32
    return %arg1, %c0_i32 : i32, i32
  }
  func.func @transform_10(%arg0: i32, %arg1: i32, %arg2: i32) -> (i32, i32) {
    %c0_i32 = arith.constant 0 : i32
    %c0_i32_0 = arith.constant 0 : i32
    return %arg1, %c0_i32 : i32, i32
  }
  func.func @transform_11(%arg0: i32, %arg1: i32, %arg2: i32) -> (i32, i32) {
    %c0_i32 = arith.constant 0 : i32
    return %arg1, %arg0 : i32, i32
  }
  func.func @transform_12(%arg0: i32, %arg1: i32, %arg2: i32) -> (i32, i32) {
    %c0_i32 = arith.constant 0 : i32
    return %arg1, %arg0 : i32, i32
  }
}

</mosaic_0001>

<bundles_post_ra>
// kernel: tpu_custom_call.1
= control target key start
LH: loop header
LB: loop body
LE: loop exit
PB: predicated region body
PF: predicated region fallthrough
CT: control target
= control target key end

     0   :  { %s3042_s0 = inlined_call_operand.hbm [shape: f32[1,16,128], index: 0, kind: input, shape index: {}]   ;;  %s3043_s1 = inlined_call_operand.hbm [shape: f32[16,128], index: 1, kind: input, shape index: {}]   ;;  %s3044_s2 = inlined_call_operand.hbm [shape: f32[16,128], index: 2, kind: input, shape index: {}]   ;;  %s3045_s3 = inlined_call_operand.hbm [shape: f32[16,256], index: 3, kind: input, shape index: {}]   ;;  %s3046_s4 = inlined_call_operand.hbm [shape: f32[16,256], index: 4, kind: input, shape index: {}]   ;;  %s3047_s5 = inlined_call_operand.hbm [shape: f32[128,256], index: 5, kind: input, shape index: {}]   ;;  %s3048_s6 = inlined_call_operand.vmem [shape: f32[1,256], index: 6, kind: input, shape index: {}]   ;;  %s3049_s7 = inlined_call_operand.hbm [shape: f32[1,16,256], index: 7, kind: output, shape index: {0}]   ;;  %s3050_s8 = inlined_call_operand.hbm [shape: f32[1,16,256], index: 8, kind: output, shape index: {1}]   ;;  %s3051_s9 = inlined_call_operand.hbm [shape: f32[16,128], index: 9, kind: output, shape index: {2}]   ;;  %s3052_s10 = inlined_call_operand.hbm [shape: f32[16,128], index: 10, kind: output, shape index: {3}]   ;;  %s3053_s11 = inlined_call_operand.hbm [shape: f32[16,256], index: 11, kind: output, shape index: {4}]   ;;  %s3054_s12 = inlined_call_operand.hbm [shape: f32[16,256], index: 12, kind: output, shape index: {5}]  }
   0x1   :  { %3117 = sst [smem:[#allocation59_spill]] %s3042_s0 }
   0x2   :  { %3118 = sst [smem:[#allocation60_spill]] %s3043_s1 }
   0x3   :  { %3119 = sst [smem:[#allocation61_spill]] %s3044_s2 }
   0x4   :  { %3120 = sst [smem:[#allocation62_spill]] %s3045_s3 }
   0x5   :  { %3121 = sst [smem:[#allocation63_spill]] %s3046_s4 }
   0x6   :  { %3122 = sst [smem:[#allocation64_spill]] %s3047_s5 }
   0x7   :  { %3123 = sst [smem:[#allocation65_spill]] %s3048_s6 }
   0x8   :  { %3124 = sst [smem:[#allocation66_spill]] %s3049_s7 }
   0x9   :  { %3125 = sst [smem:[#allocation67_spill]] %s3050_s8 }
   0xa   :  { %3126 = sst [smem:[#allocation68_spill]] %s3051_s9 }
   0xb   :  { %3127 = sst [smem:[#allocation69_spill]] %s3052_s10 }
   0xc   :  { %3128 = sst [smem:[#allocation70_spill]] %s3053_s11 }
   0xd   :  { %3129 = sst [smem:[#allocation71_spill]] %s3054_s12 }
   0xe   :  { %18 = vsyncpa [#allocation7], 0 }
   0xf   :  { %20 = vsyncpa [#allocation7 + $0x1], 0 }
  0x10   :  { %21 = vsyncpa [#allocation10], 0 }
  0x11   :  { %23 = vsyncpa [#allocation10 + $0x1], 0 }
  0x12   :  { %24 = vsyncpa [#allocation13], 0 }
  0x13   :  { %26 = vsyncpa [#allocation13 + $0x1], 0 }
  0x14   :  { %27 = vsyncpa [#allocation16], 0 }
  0x15   :  { %29 = vsyncpa [#allocation16 + $0x1], 0 }
  0x16   :  { %30 = vsyncpa [#allocation8], 0 }
  0x17   :  { %32 = vsyncpa [#allocation8 + $0x1], 0 }
  0x18   :  { %33 = vsyncpa [#allocation19], 0 }
  0x19   :  { %35 = vsyncpa [#allocation19 + $0x1], 0 }
  0x1a   :  { %36 = vsyncpa [#allocation22], 0 }
  0x1b   :  { %38 = vsyncpa [#allocation22 + $0x1], 0 }
  0x1c   :  { %39 = vsyncpa [#allocation25], 0 }
  0x1d   :  { %41 = vsyncpa [#allocation25 + $0x1], 0  ;;  %s2233_s21 = smov 0   ;;  %s2235_s22 = smov 0  }
  0x1e   :  { %s2237_s23 = smov 0   ;;  %s2239_s24 = smov 0  }
  0x1f   :  { %s2241_s25 = smov 0   ;;  %s2243_s26 = smov 0  }
  0x20   :  { %s2245_s27 = smov 0   ;;  %s2247_s28 = smov 0  }
  0x21   :  { %s2249_s29 = smov 0   ;;  %s2251_s30 = smov 0  }
  0x22   :  { %s2253_s13 = smov 0   ;;  %s2255_s14 = smov 0  }
  0x23   :  { %s2257_s15 = smov 0   ;;  %s2259_s16 = smov 0  }
  0x24 LB: > { %3130 = sst [smem:[#allocation36_spill]] %s2100_s22  ;;  %s2304_s17 = sadd.s32 4294967295, %s2148_s16   ;;  %s2148_s16 = sphi %s2259_s16, %s47_s16   ;;  %s2144_s15 = sphi %s2257_s15, %s3241_s15   ;;  %s2140_s14 = sphi %s2255_s14, %s3240_s14   ;;  %s2136_s13 = sphi %s2253_s13, %s3239_s13   ;;  %s2132_s30 = sphi %s2251_s30, %s3238_s30   ;;  %s2128_s29 = sphi %s2249_s29, %s3237_s29   ;;  %s2124_s28 = sphi %s2247_s28, %s3236_s28   ;;  %s2120_s27 = sphi %s2245_s27, %s3235_s27   ;;  %s2116_s26 = sphi %s2243_s26, %s3245_s26   ;;  %s2112_s25 = sphi %s2241_s25, %s3244_s25   ;;  %s2108_s24 = sphi %s2239_s24, %s3233_s24   ;;  %s2104_s23 = sphi %s2237_s23, %s3243_s23   ;;  %s2100_s22 = sphi %s2235_s22, %s3242_s22   ;;  %s2096_s21 = sphi %s2233_s21, %s3232_s21  }
  0x25   : > { %3131 = sst [smem:[#allocation37_spill]] %s2108_s24  ;;  %s62_s19 = sadd.s32 1, %s2140_s14 }
  0x26   : > { %3132 = sst [smem:[#allocation38_spill]] %s2112_s25  ;;  %s75_s20 = sadd.s32 1, %s2128_s29 }
  0x27   : > { %3133 = sst [smem:[#allocation39_spill]] %s2124_s28  ;;  %p2309_p0 = scmp.ge.s32.totalorder %s62_s19, 2 }
  0x28   : > { %3134 = sst [smem:[#allocation40_spill]] %s2128_s29  ;;  %p82_p1 = scmp.ne.s32.totalorder %s2128_s29, %s2124_s28 }
  0x29   : > { %3135 = sst [smem:[#allocation41_spill]] %s2132_s30  ;;  %p3075_p2 = scmp.eq.s32.totalorder %s2148_s16, 0 }
  0x2a   : > { %3136 = sst [smem:[#allocation42_spill]] %s2136_s13  ;;  %p88_p3 = scmp.ne.s32.totalorder %s2124_s28, %s2120_s27 }
  0x2b   : > { %3137 = sst [smem:[#allocation43_spill]] %s2140_s14  ;;  %s3247_s19 = smov (%p2309_p0, %s62_s19), 0 }
  0x2c   : > { %3138 = sst [smem:[#allocation44_spill]] %s2144_s15  ;;  %p2327_p4 = por %p3075_p2, %p82_p1 }
  0x2d   : > { %3139 = sst [smem:[#allocation45_spill]] %s2304_s17  ;;  %p3074_p5 = scmp.eq.s32.totalorder %s2304_s17, 0 }
  0x2e   : > { %s3140_s12 = scalar_select %p2309_p0, 1, 0 }
  0x2f   : > { %3141 = sst [smem:[#allocation46_spill]] %s3247_s19  ;;  %s2334_s9 = ssub.s32 %s2140_s14, %s3247_s19 }
  0x30   : > { %p216_p6 = scmp.ne.s32.totalorder %s2104_s23, %s2100_s22  ;;  %p73_p7 = scmp.eq.s32.totalorder %s2334_s9, 0 }
  0x31   : > { %p2344_p8 = por %p3074_p5, %p88_p3  ;;  %p222_p10 = scmp.ne.s32.totalorder %s2100_s22, %s2096_s21 }
  0x32   : > { %p2350_p9 = por %p216_p6, %p3075_p2  ;;  %p3073_p12 = scmp.eq.s32.totalorder %s2304_s17, 3 }
  0x33   : > { %s3143_s7 = scalar_select %p2344_p8, 1, 0 }
  0x34   : > { %s2357_s19 = scalar_select %p73_p7, %s2128_s29, %s75_s20  }
  0x35   : > { %3144 = sst [smem:[#allocation47_spill]] %s3143_s7  ;;  %p2361_p11 = por %p222_p10, %p3074_p5 }
  0x36   : > { %3146 = sst [smem:[#allocation48_spill]] %s2357_s19  ;;  %s3149_s11 = sadd.s32 4294967294, %s2148_s16  }
  0x37   : > { %s3147_s6 = scalar_select %p2361_p11, 1, 0 }
  0x38   : > { %p2368_p13 = scmp.eq.s32.totalorder %s3149_s11, 3  ;;  %p2377_p6 = por %p3073_p12, %p82_p1 }
  0x39   : > { %3148 = sst [smem:[#allocation49_spill]] %s3147_s6  ;;  %p3080_p7 = scmp.lt.s32.totalorder %s2148_s16, 4 }
  0x3a   : > { %s3150_s10 = scalar_select %p2368_p13, 1, 0 }
  0x3b   : > { %s3151_s21 = scalar_select %p2377_p6, 1, 0 }
  0x3c   : > { %p2387_p10 = por %p2368_p13, %p88_p3  ;;  %s3069_s19 = sand.u32 1, %s2128_s29  }
  0x3d   : > { %3152 = sst [smem:[#allocation50_spill]] %s3151_s21  ;;  %s2394_s11 = sshll.u32 %s3069_s19, 3 }
  0x3e   : > { %s3153_s20 = scalar_select %p2387_p10, 1, 0 }
  0x3f   : > { %s2397_s13 = sshll.u32 %s2140_s14, 7  ;;  %p2403_p1 = pnand %p3080_p7, %p2327_p4 }
  0x40   : > { %3154 = sst [smem:[#allocation51_spill]] %s3153_s20  ;;  %s3084_s27 = sand.u32 1, %s2148_s16  }
  0x41   : > { %s3155_s30 = scalar_select %p2403_p1, 1, 0 }
  0x42   : > { %s3156_s1 = sld [smem:[#allocation60_spill]]  ;;  %s464_s19 = scalar_lea.vmem [#allocation9], %s2394_s11 }
  0x43   : > { %s471_s22 = sshll.u32 %s464_s19, 4  ;;  %p2419_p3 = pnand %p3080_p7, %p2350_p9  ;;  %s2423_s22 = int_to_ptr.vmem [resolvable:$true] %s471_s22 }
  0x44   : > { %s2428_s7 = scalar_lea.sflag [#allocation10], %s3084_s27  ;;  %p2434_p5 = pneg %p2403_p1 }
  0x45   : > { %s3157_s18 = scalar_select %p2419_p3, 1, 0 }
  0x46   : > { %3159 = sst [smem:[#allocation53_spill]] %s2428_s7 }
  0x47   : > { %3158 = sst [smem:[#allocation52_spill]] %s3157_s18 }
  0x48   : > { %s2412_s20 = scalar_lea.hbm %s3156_s1, %s2397_s13  ;;  %s1655_s28 = scalar_lea.hbm %s3156_s1, 256 }
  0x49   : > { %s1650_s6 = scalar_lea.hbm %s2412_s20, 128  ;;  %p1656_p7 = scmp.lt.u32.totalorder %s2412_s20, %s3156_s1 }
  0x4a   : > { %p1651_p12 = scmp.ne.s32.totalorder %s2412_s20, %s1650_s6  ;;  %p1657_p4 = scmp.lt.u32.totalorder %s1655_s28, %s1650_s6 }
  0x4b   : > { %p1659_p6 = scmp.lt.u32.totalorder %s1650_s6, %s2412_s20 }
  0x4c   : > { %p1653_p2 = pnand %p2434_p5, %p1651_p12  ;;  %p1658_p10 = por %p1657_p4, %p1656_p7 }
  0x4e   : > { %p1654_p9 = pneg %p1653_p2  ;;  %p1660_p11 = por %p1659_p6, %p1658_p10 }
  0x50   : > { %p1661_p8 = pnand %p1660_p11, %p1654_p9 }
  0x52   : > { %1664 = shalt.err (!%p1661_p8)
}
  0x53   : > { %s1665_s27 = scalar_lea.vmem %s2423_s22, 128  ;;  %s2150_s8 = smov [#allocation9]  }
  0x54   : > { %p1666_p2 = scmp.ne.s32.totalorder %s2423_s22, %s1665_s27  ;;  %s1670_s19 = sshll.u32 %s2150_s8, 4  ;;  %s1671_s19 = int_to_ptr.vmem [resolvable:$false] %s1670_s19 }
  0x55   : > { %s1672_s5 = scalar_lea.vmem %s1671_s19, 256  ;;  %p1673_p13 = scmp.lt.s32.totalorder %s2423_s22, %s1671_s19 }
  0x56   : > { %p1668_p12 = pnand %p1666_p2, %p2434_p5  ;;  %p1674_p0 = scmp.lt.s32.totalorder %s1672_s5, %s1665_s27 }
  0x58   : > { %p1669_p3 = pneg %p1668_p12  ;;  %p1675_p7 = por %p1674_p0, %p1673_p13 }
  0x5a   : > { %p1676_p4 = pnand %p1675_p7, %p1669_p3 }
  0x5c   : > { %1679 = shalt.err (!%p1676_p4)
}
  0x5d   : > { %1498 = dma.hbm_to_vmem [thread:$0]  (!%p2403_p1), %s2412_s20, 128, %s2423_s22, %s2428_s7  }
  0x5e   : > { %p560_p0 = scmp.lt.s32.totalorder %s2148_s16, 5  ;;  %p3161_p8 = scmp.ge.s32.totalorder %s2148_s16, 1 }
  0x5f   : > { %s66_s27 = sadd.s32 1, %s2144_s15  ;;  %p3164_p13 = scmp.ne.s32.totalorder %s3140_s12, 0 }
  0x60   : > { %p2461_p11 = pnand %p3161_p8, %p560_p0  ;;  %s155_s18 = sadd.s32 1, %s2116_s26 }
  0x61   : > { %s3249_s27 = smov (!%p3164_p13, %s66_s27), %s2144_s15  ;;  %p162_p6 = scmp.ne.s32.totalorder %s2116_s26, %s2112_s25 }
  0x62   : > { %s3162_s28 = scalar_select %p2461_p11, 1, 0 }
  0x63   : > { %p68_p10 = scmp.ge.s32.totalorder %s3249_s27, 2  ;;  %p168_p3 = scmp.ne.s32.totalorder %s2112_s25, %s2108_s24 }
  0x64   : > { %3163 = sst [smem:[#allocation54_spill]] %s3162_s28  ;;  %p3165_p9 = scmp.eq.s32.totalorder %s2148_s16, 0 }
  0x65   : > { %s209_s20 = sadd.s32 1, %s2104_s23  ;;  %s3251_s27 = smov (%p68_p10, %s3249_s27), 0 }
  0x66   : > { %p2476_p2 = por %p162_p6, %p3165_p9  ;;  %3167 = sst [smem:[#allocation55_spill]] %s3251_s27 }
  0x67   : > { %p3168_p12 = scmp.eq.s32.totalorder %s2304_s17, 0  ;;  %p3171_p4 = scmp.eq.s32.totalorder %s2304_s17, 3 }
  0x68   : > { %s151_s8 = ssub.s32 %s2144_s15, %s3251_s27  ;;  %p3174_p8 = scmp.ne.s32.totalorder %s3150_s10, 0 }
  0x69   : > { %p2485_p7 = por %p168_p3, %p3168_p12  ;;  %p2491_p0 = por %p3171_p4, %p162_p6 }
  0x6a   : > { %p2499_p13 = por %p3174_p8, %p168_p3  ;;  %s152_s5 = sor.u32 %s151_s8, %s2334_s9 }
  0x6b   : > { %s3169_s12 = scalar_select %p2485_p7, 1, 0 }
  0x6c   : > { %s3172_s6 = scalar_select %p2491_p0, 1, 0 }
  0x6d   : > { %3170 = sst [smem:[#allocation56_spill]] %s3169_s12  ;;  %p207_p10 = scmp.eq.s32.totalorder %s151_s8, 0 }
  0x6e   : > { %3173 = sst [smem:[#allocation57_spill]] %s3172_s6  ;;  %p153_p9 = scmp.eq.s32.totalorder %s152_s5, 0 }
  0x6f   : > { %s3175_s19 = scalar_select %p2499_p13, 1, 0 }
  0x70   : > { %s2505_s1 = scalar_select %p207_p10, %s2104_s23, %s209_s20  }
  0x71   : > { %s2508_s24 = scalar_select %p153_p9, %s2116_s26, %s155_s18  }
  0x72   : > { %s498_s12 = sand.u32 1, %s2116_s26   ;;  %s1352_s25 = sshll.u32 %s2140_s14, 1 }
  0x73   : > { %3176 = sst [smem:[#allocation58_spill]] %s2508_s24  ;;  %s2512_s17 = sshll.u32 %s498_s12, 3 }
  0x74   : > { %s505_s10 = sadd.s32 %s2144_s15, %s1352_s25  ;;  %s3177_s3 = sld [smem:[#allocation62_spill]] }
  0x75   : > { %s1353_s27 = sshll.u32 %s505_s10, 7  ;;  %s500_s9 = scalar_lea.vmem [#allocation12], %s2512_s17 }
  0x76   : > { %s509_s20 = sshll.u32 %s500_s9, 4  ;;  %p3178_p6 = scmp.lt.s32.totalorder %s2148_s16, 4  ;;  %s2521_s20 = int_to_ptr.vmem [resolvable:$true] %s509_s20 }
  0x77   : > { %s3180_s4 = sld [smem:[#allocation63_spill]]  ;;  %s3181_s6 = sand.u32 1, %s2148_s16  }
  0x78   : > { %p2527_p3 = pnand %p3178_p6, %p2476_p2  ;;  %s2538_s8 = scalar_lea.sflag [#allocation13], %s3181_s6 }
  0x7a   : > { %s2518_s7 = scalar_lea.hbm %s3177_s3, %s1353_s27  ;;  %p3103_p4 = pneg %p2527_p3 }
  0x7b   : > { %s3179_s18 = scalar_select %p2527_p3, 1, 0 }
  0x7c   : > { %s1680_s5 = scalar_lea.hbm %s2518_s7, 128  ;;  %s1685_s9 = scalar_lea.hbm %s3177_s3, 512 }
  0x7d   : > { %s2534_s28 = scalar_lea.hbm %s3180_s4, %s1353_s27  ;;  %p1681_p12 = scmp.ne.s32.totalorder %s2518_s7, %s1680_s5 }
  0x7e   : > { %p1686_p10 = scmp.lt.u32.totalorder %s2518_s7, %s3177_s3  ;;  %p1687_p9 = scmp.lt.u32.totalorder %s1685_s9, %s1680_s5 }
  0x7f   : > { %p1683_p2 = pnand %p3103_p4, %p1681_p12  ;;  %p1689_p13 = scmp.lt.u32.totalorder %s1680_s5, %s2518_s7 }
  0x80   : > { %p1688_p6 = por %p1687_p9, %p1686_p10 }
  0x81   : > { %p1684_p8 = pneg %p1683_p2 }
  0x82   : > { %p1690_p0 = por %p1689_p13, %p1688_p6 }
  0x84   : > { %p1691_p7 = pnand %p1690_p0, %p1684_p8 }
  0x86   : > { %1694 = shalt.err (!%p1691_p7)
}
  0x87   : > { %s1695_s27 = scalar_lea.vmem %s2521_s20, 128  ;;  %s2151_s6 = smov [#allocation12]  }
  0x88   : > { %p1696_p12 = scmp.ne.s32.totalorder %s2521_s20, %s1695_s27  ;;  %s1700_s22 = sshll.u32 %s2151_s6, 4  ;;  %s1701_s22 = int_to_ptr.vmem [resolvable:$false] %s1700_s22 }
  0x89   : > { %s1702_s10 = scalar_lea.vmem %s1701_s22, 256  ;;  %p1703_p1 = scmp.lt.s32.totalorder %s2521_s20, %s1701_s22 }
  0x8a   : > { %p1698_p2 = pnand %p1696_p12, %p3103_p4  ;;  %p1704_p10 = scmp.lt.s32.totalorder %s1702_s10, %s1695_s27 }
  0x8c   : > { %p1699_p11 = pneg %p1698_p2  ;;  %p1705_p9 = por %p1704_p10, %p1703_p1 }
  0x8e   : > { %p1706_p13 = pnand %p1705_p9, %p1699_p11 }
  0x90   : > { %1709 = shalt.err (!%p1706_p13)
}
  0x91   : > { %1504 = dma.hbm_to_vmem [thread:$0]  (!%p2527_p3), %s2518_s7, 128, %s2521_s20, %s2538_s8  }
  0x92   : > { %s3182_s0 = sld [smem:[#allocation59_spill]]  ;;  %s444_s12 = scalar_lea.vmem [#allocation6], %s2394_s11 }
  0x93   : > { %s453_s27 = sshll.u32 %s444_s12, 4  ;;  %s3183_s2 = sld [smem:[#allocation61_spill]]  ;;  %s2573_s27 = int_to_ptr.vmem [resolvable:$true] %s453_s27 }
  0x94   : > { %s3184_s3 = sand.u32 1, %s2128_s29  }
  0x95   : > { %s441_s7 = scalar_lea.sflag [#allocation7], %s3184_s3 }
  0x98   : > { %s2570_s25 = scalar_lea.hbm %s3182_s0, %s2397_s13  ;;  %s1715_s14 = scalar_lea.hbm %s3182_s0, 256 }
  0x99   : > { %s2579_s10 = scalar_lea.hbm %s3183_s2, %s2397_s13  ;;  %s1710_s20 = scalar_lea.hbm %s2570_s25, 128 }
  0x9a   : > { %p1711_p1 = scmp.ne.s32.totalorder %s2570_s25, %s1710_s20  ;;  %p1716_p0 = scmp.lt.u32.totalorder %s2570_s25, %s3182_s0 }
  0x9b   : > { %p1717_p8 = scmp.lt.u32.totalorder %s1715_s14, %s1710_s20  ;;  %p1719_p12 = scmp.lt.u32.totalorder %s1710_s20, %s2570_s25 }
  0x9c   : > { %p1713_p11 = pnand %p1711_p1, %p2434_p5 }
  0x9d   : > { %p1718_p6 = por %p1717_p8, %p1716_p0 }
  0x9e   : > { %p1714_p7 = pneg %p1713_p11 }
  0x9f   : > { %p1720_p2 = por %p1719_p12, %p1718_p6 }
  0xa1   : > { %p1721_p10 = pnand %p1720_p2, %p1714_p7 }
  0xa3   : > { %1724 = shalt.err (!%p1721_p10)
}
  0xa4   : > { %s1725_s3 = scalar_lea.vmem %s2573_s27, 128  ;;  %s2152_s13 = smov [#allocation6]  }
  0xa5   : > { %p1726_p9 = scmp.ne.s32.totalorder %s2573_s27, %s1725_s3  ;;  %s1730_s6 = sshll.u32 %s2152_s13, 4  ;;  %s1731_s6 = int_to_ptr.vmem [resolvable:$false] %s1730_s6 }
  0xa6   : > { %s1732_s24 = scalar_lea.vmem %s1731_s6, 256  ;;  %p1733_p11 = scmp.lt.s32.totalorder %s2573_s27, %s1731_s6 }
  0xa7   : > { %p1728_p13 = pnand %p1726_p9, %p2434_p5  ;;  %p1734_p4 = scmp.lt.s32.totalorder %s1732_s24, %s1725_s3 }
  0xa9   : > { %p1729_p1 = pneg %p1728_p13  ;;  %p1735_p0 = por %p1734_p4, %p1733_p11 }
  0xab   : > { %p1736_p8 = pnand %p1735_p0, %p1729_p1 }
  0xad   : > { %1739 = shalt.err (!%p1736_p8)
}
  0xae   : > { %p3185_p7 = scmp.ne.s32.totalorder %s3155_s30, 0  ;;  %s482_s14 = scalar_lea.vmem [#allocation11], %s2394_s11 }
  0xaf   : > { %s489_s22 = sshll.u32 %s482_s14, 4  ;;  %s520_s20 = scalar_lea.vmem [#allocation14], %s2512_s17  ;;  %s490_s22 = int_to_ptr.vmem [resolvable:$true] %s489_s22 }
  0xb0   : > { %1495 = dma.hbm_to_vmem [thread:$0]  (!%p3185_p7), %s2570_s25, 128, %s2573_s27, %s441_s7  }
  0xb1   : > { %s529_s5 = sshll.u32 %s520_s20, 4  ;;  %s1740_s9 = scalar_lea.hbm %s2579_s10, 128  ;;  %s2606_s5 = int_to_ptr.vmem [resolvable:$true] %s529_s5 }
  0xb2   : > { %p1741_p4 = scmp.ne.s32.totalorder %s2579_s10, %s1740_s9  ;;  %s1745_s13 = scalar_lea.hbm %s3183_s2, 256 }
  0xb3   : > { %p1746_p2 = scmp.lt.u32.totalorder %s2579_s10, %s3183_s2  ;;  %p1747_p10 = scmp.lt.u32.totalorder %s1745_s13, %s1740_s9 }
  0xb4   : > { %p1743_p6 = pnand %p1741_p4, %p2434_p5  ;;  %p1749_p13 = scmp.lt.u32.totalorder %s1740_s9, %s2579_s10 }
  0xb5   : > { %p1748_p9 = por %p1747_p10, %p1746_p2 }
  0xb6   : > { %p1744_p12 = pneg %p1743_p6 }
  0xb7   : > { %p1750_p1 = por %p1749_p13, %p1748_p9 }
  0xb9   : > { %p1751_p11 = pnand %p1750_p1, %p1744_p12 }
  0xbb   : > { %1754 = shalt.err (!%p1751_p11)
}
  0xbc   : > { %s1755_s17 = scalar_lea.vmem %s490_s22, 128  ;;  %s2153_s11 = smov [#allocation11]  }
  0xbd   : > { %p1756_p0 = scmp.ne.s32.totalorder %s490_s22, %s1755_s17  ;;  %s1760_s25 = sshll.u32 %s2153_s11, 4  ;;  %s1761_s25 = int_to_ptr.vmem [resolvable:$false] %s1760_s25 }
  0xbe   : > { %s1762_s27 = scalar_lea.vmem %s1761_s25, 256  ;;  %p1763_p6 = scmp.lt.s32.totalorder %s490_s22, %s1761_s25 }
  0xbf   : > { %p1758_p8 = pnand %p1756_p0, %p2434_p5  ;;  %p1764_p3 = scmp.lt.s32.totalorder %s1762_s27, %s1755_s17 }
  0xc1   : > { %p1759_p4 = pneg %p1758_p8  ;;  %p1765_p7 = por %p1764_p3, %p1763_p6 }
  0xc3   : > { %p1766_p2 = pnand %p1765_p7, %p1759_p4 }
  0xc5   : > { %1769 = shalt.err (!%p1766_p2)
}
  0xc6   : > { %p3186_p10 = scmp.ne.s32.totalorder %s3155_s30, 0  ;;  %s3187_s7 = sld [smem:[#allocation53_spill]] }
  0xc7   : > { %s1770_s21 = scalar_lea.hbm %s2534_s28, 128  ;;  %p3188_p12 = scmp.ne.s32.totalorder %s3179_s18, 0 }
  0xc8   : > { %p1771_p5 = scmp.ne.s32.totalorder %s2534_s28, %s1770_s21  ;;  %s1775_s9 = scalar_lea.hbm %s3180_s4, 512 }
  0xc9   : > { %p3189_p9 = pneg %p3188_p12  ;;  %p1776_p3 = scmp.lt.u32.totalorder %s2534_s28, %s3180_s4 }
  0xca   : > { %p1777_p7 = scmp.lt.u32.totalorder %s1775_s9, %s1770_s21  ;;  %p1779_p0 = scmp.lt.u32.totalorder %s1770_s21, %s2534_s28 }
  0xcb   : > { %p1773_p13 = pnand %p1771_p5, %p3189_p9 }
  0xcc   : > { %1501 = dma.hbm_to_vmem [thread:$0]  (!%p3186_p10), %s2579_s10, 128, %s490_s22, %s3187_s7  }
  0xcd   : > { %p1774_p1 = pneg %p1773_p13  ;;  %p1778_p11 = por %p1777_p7, %p1776_p3 }
  0xcf   : > { %p1780_p8 = por %p1779_p0, %p1778_p11 }
  0xd1   : > { %p1781_p4 = pnand %p1780_p8, %p1774_p1 }
  0xd3   : > { %1784 = shalt.err (!%p1781_p4)
}
  0xd4   : > { %s1785_s10 = scalar_lea.vmem %s2606_s5, 128  ;;  %p3190_p2 = pmov %p3189_p9 }
  0xd5   : > { %p1786_p6 = scmp.ne.s32.totalorder %s2606_s5, %s1785_s10  ;;  %s2154_s22 = smov [#allocation14]  }
  0xd6   : > { %s1790_s3 = sshll.u32 %s2154_s22, 4  ;;  %s1791_s3 = int_to_ptr.vmem [resolvable:$false] %s1790_s3 }
  0xd7   : > { %p1788_p10 = pnand %p1786_p6, %p3190_p2  ;;  %s1792_s13 = scalar_lea.vmem %s1791_s3, 256 }
  0xd8   : > { %p1793_p9 = scmp.lt.s32.totalorder %s2606_s5, %s1791_s3  ;;  %p1794_p13 = scmp.lt.s32.totalorder %s1792_s13, %s1785_s10 }
  0xd9   : > { %p1789_p5 = pneg %p1788_p10 }
  0xda   : > { %p1795_p3 = por %p1794_p13, %p1793_p9 }
  0xdc   : > { %p1796_p7 = pnand %p1795_p3, %p1789_p5 }
  0xde   : > { %1799 = shalt.err (!%p1796_p7)
}
  0xdf   : > { %s3191_s6 = sld [smem:[#allocation52_spill]]  ;;  %s536_s24 = sand.u32 1, %s2104_s23  }
  0xe0   : > { %1507 = dma.hbm_to_vmem [thread:$0]  (!%p3188_p12), %s2534_s28, 128, %s2606_s5, %s2538_s8  }
  0xe1   : > { %s1358_s17 = sshll.u32 %s2144_s15, 7  ;;  %s1357_s11 = sshll.u32 %s536_s24, 7 }
  0xe2   : > { %s3192_s7 = sld [smem:[#allocation64_spill]]  ;;  %s540_s18 = scalar_lea.vmem [#allocation15], %s1357_s11 }
  0xe3   : > { %s546_s14 = sshll.u32 %s540_s18, 4  ;;  %s2659_s20 = scalar_lea.sflag [#allocation16], %s536_s24  ;;  %s2657_s14 = int_to_ptr.vmem [resolvable:$true] %s546_s14 }
  0xe5   : > { %p3193_p1 = scmp.ne.s32.totalorder %s3191_s6, 0 }
  0xe7   : > { %p1802_p11 = pneg %p3193_p1 }
  0xe8   : > { %s2655_s21 = scalar_lea.hbm %s3192_s7, %s1358_s17  ;;  %s1805_s5 = scalar_lea.hbm %s3192_s7, 4096 }
  0xe9   : > { %s1800_s9 = scalar_lea.hbm %s2655_s21, 2048  ;;  %p1806_p4 = scmp.lt.u32.totalorder %s2655_s21, %s3192_s7 }
  0xea   : > { %p1801_p12 = scmp.ne.s32.totalorder %s2655_s21, %s1800_s9  ;;  %p1807_p6 = scmp.lt.u32.totalorder %s1805_s5, %s1800_s9 }
  0xeb   : > { %p1809_p10 = scmp.lt.u32.totalorder %s1800_s9, %s2655_s21 }
  0xec   : > { %p1803_p0 = pnand %p1802_p11, %p1801_p12  ;;  %p1808_p2 = por %p1807_p6, %p1806_p4 }
  0xee   : > { %p1804_p8 = pneg %p1803_p0  ;;  %p1810_p5 = por %p1809_p10, %p1808_p2 }
  0xf0   : > { %p1811_p9 = pnand %p1810_p5, %p1804_p8 }
  0xf2   : > { %1814 = shalt.err (!%p1811_p9)
}
  0xf3   : > { %s1815_s10 = scalar_lea.vmem %s2657_s14, 2048  ;;  %s2155_s22 = smov [#allocation15]  }
  0xf4   : > { %p1816_p13 = scmp.ne.s32.totalorder %s2657_s14, %s1815_s10  ;;  %s1820_s3 = sshll.u32 %s2155_s22, 4  ;;  %s1821_s3 = int_to_ptr.vmem [resolvable:$false] %s1820_s3 }
  0xf5   : > { %s1822_s13 = scalar_lea.vmem %s1821_s3, 4096  ;;  %p1823_p12 = scmp.lt.s32.totalorder %s2657_s14, %s1821_s3 }
  0xf6   : > { %p1818_p3 = pnand %p1816_p13, %p1802_p11  ;;  %p1824_p0 = scmp.lt.s32.totalorder %s1822_s13, %s1815_s10 }
  0xf8   : > { %p1819_p7 = pneg %p1818_p3  ;;  %p1825_p4 = por %p1824_p0, %p1823_p12 }
  0xfa   : > { %p1826_p6 = pnand %p1825_p4, %p1819_p7 }
  0xfc   : > { %1829 = shalt.err (!%p1826_p6)
}
  0xfd   : > { %s2156_s24 = smov 256   ;;  %s2157_s17 = smov 128  }
  0xfe   : > { %s2158_s11 = smov 8   ;;  %s3194_s25 = sld [smem:[#allocation54_spill]] }
  0xff   : > { %1510 = dma.hbm_to_vmem [thread:$0]  (!%p3193_p1), %s2655_s21, 2048, %s2657_s14, %s2659_s20, %s2156_s24, %s2157_s17, %s2158_s11  }
 0x104   : > { %p3195_p11 = scmp.ne.s32.totalorder %s3194_s25, 0 }
 0x105   : > { %s3196_s27 = sld [smem:[#allocation39_spill]] (!%p3195_p11)  ;;  %s3197_s18 = sld [smem:[#allocation47_spill]] (!%p3195_p11) }
 0x106   : > { %564 = sbr.rel (%p3195_p11) target bundleno = 635 (0x27b), region = 48 }
 0x10b   : > { %s566_s9 = sand.u32 (!%p3195_p11), 1, %s3196_s27   ;;  %p3198_p8 = scmp.ne.s32.totalorder (!%p3195_p11), %s3197_s18, 0 }
 0x10c   : > { %s2690_s28 = sshll.u32 (!%p3195_p11), %s566_s9, 3  ;;  %s567_s8 = scalar_lea.sflag (!%p3195_p11), [#allocation7], %s566_s9 }
 0x10d   : > { %s570_s5 = scalar_lea.vmem [#allocation6], %s2690_s28 }
 0x10e   : > { %2055 = dma.done.wait (%p3198_p8), %s567_s8, 128  }
 0x10f   : > { %2057 = vsyncadd (%p3198_p8), %s567_s8, 4294967168  ;;  %s3199_s12 = sld [smem:[#allocation45_spill]]  ;;  %s579_s14 = scalar_lea.vmem [#allocation9], %s2690_s28 }
 0x115   : > { %s2698_s6 = sand.u32 1, %s3199_s12  }
 0x116   : > { %s576_s21 = scalar_lea.sflag [#allocation10], %s2698_s6 }
 0x117   : > { %2059 = dma.done.wait (%p3198_p8), %s576_s21, 256  }
 0x118   : > { %2061 = vsyncadd (%p3198_p8), %s576_s21, 4294967040  ;;  %s3200_s20 = sld [smem:[#allocation38_spill]]  ;;  %s3201_s30 = sld [smem:[#allocation56_spill]] }
 0x119   : > { %s588_s3 = scalar_lea.vmem [#allocation11], %s2690_s28  ;;  %s594_s13 = scalar_lea.sflag [#allocation13], %s2698_s6 }
 0x11e   : > { %s2707_s10 = sand.u32 1, %s3200_s20   ;;  %p3202_p1 = scmp.ne.s32.totalorder %s3201_s30, 0 }
 0x11f   : > { %s2710_s22 = sshll.u32 %s2707_s10, 3 }
 0x120   : > { %s597_s24 = scalar_lea.vmem [#allocation12], %s2710_s22 }
 0x121   : > { %2063 = dma.done.wait (%p3202_p1), %s594_s13, 256  }
 0x122   : > { %2065 = vsyncadd (%p3202_p1), %s594_s13, 4294967040  ;;  %s3203_s17 = sld [smem:[#allocation36_spill]]  ;;  %s3204_s11 = sld [smem:[#allocation49_spill]] }
 0x123   : > { %s606_s18 = scalar_lea.vmem [#allocation14], %s2710_s22 }
 0x128   : > { %s611_s25 = sand.u32 1, %s3203_s17   ;;  %p3205_p2 = scmp.ne.s32.totalorder %s3204_s11, 0 }
 0x129   : > { %s1365_s27 = sshll.u32 %s611_s25, 7  ;;  %s612_s9 = scalar_lea.sflag [#allocation16], %s611_s25 }
 0x12a   : > { %s2721_s8 = scalar_lea.vmem [#allocation15], %s1365_s27 }
 0x12b   : > { %2067 = dma.done.wait (%p3205_p2), %s612_s9, 2048  }
 0x12c   : > { %2069 = vsyncadd (%p3205_p2), %s612_s9, 4294965248  ;;  %v2159_v0 = vmov 0.0|0.0   ;;  %vm2160_vm0 = vmmov 0   ;;  %v2161_v1 = vmov 0.0   ;;  %v737_v2 = vld [vmem:[%s2721_s8] sm:$0xff]  ;;  %v738_v3 = vld [vmem:[%s2721_s8 + $0x8] sm:$0xff] }
 0x12d   : > { %1444 = vmatprep.subr.bf16.mxu0 %v2159_v0  ;;  %1441 = vmatprep.mubr.msk.f32.mxu0 %vm2160_vm0, %v2161_v1  ;;  %v739_v4 = vld [vmem:[%s2721_s8 + $0x10] sm:$0xff]  ;;  %v1445_v5 = vpack.c.bf16 %v738_v3, %v737_v2  ;;  %v740_v6 = vld [vmem:[%s2721_s8 + $0x18] sm:$0xff]  ;;  %v741_v8 = vld [vmem:[%s2721_s8 + $0x20] sm:$0xff]  ;;  %s3106_s12 = scalar_lea.vmem [#allocation23], %s2710_s22  ;;  %s3206_s21 = sld [smem:[#allocation41_spill]] }
 0x12e   : > { %v1448_v7 = vpack.c.bf16 %v740_v6, %v739_v4  ;;  %v742_v9 = vld [vmem:[%s2721_s8 + $0x28] sm:$0xff]  ;;  %v722_v12 = vld [vmem:[%s606_s18] sm:$0xff]  ;;  %v745_v18 = vld [vmem:[%s2721_s8 + $0x40] sm:$0xff]  ;;  %s3207_s20 = sld [smem:[#allocation42_spill]]  ;;  %s694_s13 = scalar_lea.vmem [#allocation21], %s2690_s28 }
 0x12f   : > { %1446 = vmatpush3.bf16.msra.mxu0 %v1445_v5  ;;  %v1451_v10 = vpack.c.bf16 %v742_v9, %v741_v8  ;;  %v720_v11 = vld [vmem:[%s597_s24] sm:$0xff]  ;;  %v743_v13 = vld [vmem:[%s2721_s8 + $0x30] sm:$0xff]  ;;  %v744_v14 = vld [vmem:[%s2721_s8 + $0x38] sm:$0xff]  ;;  %s3209_s25 = sld [smem:[#allocation69_spill]]  ;;  %s937_s9 = sshll.u32 %s694_s13, 4  ;;  %s938_s9 = int_to_ptr.vmem [resolvable:$true] %s937_s9 }
 0x130   : > { %1447 = vmatprep.subr.bf16.mxu0 %v2159_v0  ;;  %v734_v15 = vmul.f32 0.65, %v720_v11  ;;  %v1454_v17 = vpack.c.bf16 %v744_v14, %v743_v13  ;;  %v746_v19 = vld [vmem:[%s2721_s8 + $0x48] sm:$0xff]  ;;  %v747_v21 = vld [vmem:[%s2721_s8 + $0x50] sm:$0xff]  ;;  %v748_v22 = vld [vmem:[%s2721_s8 + $0x58] sm:$0xff] }
 0x131   : > { %v1457_v20 = vpack.c.bf16 %v746_v19, %v745_v18  ;;  %v1460_v23 = vpack.c.bf16 %v748_v22, %v747_v21  ;;  %v749_v24 = vld [vmem:[%s2721_s8 + $0x60] sm:$0xff]  ;;  %v750_v25 = vld [vmem:[%s2721_s8 + $0x68] sm:$0xff]  ;;  %v718_v28 = vld [vmem:[%s588_s3] sm:$0xff] }
 0x132   : > { %v2736_v16 = vsub.f32 %v734_v15, %v722_v12  ;;  %v1463_v26 = vpack.c.bf16 %v750_v25, %v749_v24  ;;  %v716_v27 = vld [vmem:[%s579_s14] sm:$0xff]  ;;  %v751_v29 = vld [vmem:[%s2721_s8 + $0x70] sm:$0xff]  ;;  %v752_v30 = vld [vmem:[%s2721_s8 + $0x78] sm:$0xff]  ;;  %v727_v32 = vmul.f32 10.0, %v718_v28  ;;  %s3208_s14 = sld [smem:[#allocation50_spill]] }
 0x133   : > { %1449 = vmatpush3.bf16.msra.mxu0 %v1448_v7  ;;  %v726_v31 = vmul.f32 0.9, %v716_v27  ;;  %v1466_v33 = vpack.c.bf16 %v752_v30, %v751_v29  ;;  %v730_v35 = vld [vmem:[%s570_s5] sm:$0xff]  ;;  %v729_v36 = vmul.f32 0.85, %v718_v28  ;;  %s1380_s30 = sshll.u32 %s3206_s21, 1 }
 0x134   : > { %1450 = vmatprep.subr.bf16.mxu0 %v2159_v0  ;;  %848 = vst [vmem:[%s3106_s12] sm:$0xff] %v2736_v16  ;;  %v731_v37 = vmul.f32 6.6666665, %v730_v35  ;;  %s888_s3 = sadd.s32 %s3207_s20, %s1380_s30  ;;  %s3107_s24 = sshll.u32 %s3206_s21, 7 }
 0x135   : > { %v728_v34 = vadd.f32 %v727_v32, %v726_v31  ;;  %s3210_s18 = smov %s3209_s25  ;;  %s2765_s27 = scalar_lea.hbm %s3209_s25, %s3107_s24 }
 0x136   : > { %v732_v38 = vadd.f32 %v731_v37, %v729_v36  ;;  %s2767_s8 = sshll.u32 %s888_s3, 7  ;;  %s867_s5 = scalar_lea.sflag [#allocation22], %s2698_s6 }
 0x137   : > { %1452 = vmatpush3.bf16.msra.mxu0 %v1451_v10  ;;  %s1830_s12 = scalar_lea.vmem %s938_s9, 128  ;;  %s2162_s30 = smov [#allocation21]  }
 0x138   : > { %1453 = vmatprep.subr.bf16.mxu0 %v2159_v0  ;;  %846 = vst [vmem:[%s694_s13] sm:$0xff] %v732_v38  ;;  %p1831_p10 = scmp.ne.s32.totalorder %s938_s9, %s1830_s12  ;;  %p3211_p5 = scmp.ne.s32.totalorder %s3208_s14, 0 }
 0x139   : > { %s1834_s0 = sshll.u32 %s2162_s30, 4  ;;  %s1835_s0 = int_to_ptr.vmem [resolvable:$false] %s1834_s0 }
 0x13a   : > { %p1832_p9 = pnand %p1831_p10, %p3211_p5  ;;  %s1836_s2 = scalar_lea.vmem %s1835_s0, 256 }
 0x13b   : > { %1455 = vmatpush3.bf16.msra.mxu0 %v1454_v17  ;;  %p1837_p3 = scmp.lt.s32.totalorder %s938_s9, %s1835_s0  ;;  %p1838_p7 = scmp.lt.s32.totalorder %s1836_s2, %s1830_s12 }
 0x13c   : > { %1456 = vmatprep.subr.bf16.mxu0 %v2159_v0  ;;  %p1833_p13 = pneg %p1832_p9 }
 0x13d   : > { %p1839_p12 = por %p1838_p7, %p1837_p3 }
 0x13f   : > { %1458 = vmatpush3.bf16.msra.mxu0 %v1457_v20  ;;  %p1840_p0 = pnand %p1839_p12, %p1833_p13 }
 0x140   : > { %1459 = vmatprep.subr.bf16.mxu0 %v2159_v0 }
 0x143   : > { %1461 = vmatpush3.bf16.msra.mxu0 %v1460_v23 }
 0x144   : > { %1462 = vmatprep.subr.bf16.mxu0 %v2159_v0 }
 0x147   : > { %1464 = vmatpush3.bf16.msra.mxu0 %v1463_v26 }
 0x148   : > { %1465 = vmatprep.subr.bf16.mxu0 %v2159_v0 }
 0x14b   : > { %1467 = vmatpush3.bf16.msra.mxu0 %v1466_v33 }
 0x14e   : > { %1442 = vmatmul.mubr.f32.vlgmr.msra.gmra.mrb[0].mxu0 %v728_v34 }
 0x14f   : > { %1843 = shalt.err (!%p1840_p0)
}
 0x150   : > { %s1844_s3 = scalar_lea.hbm %s2765_s27, 128  ;;  %s1848_s11 = scalar_lea.hbm %s3210_s18, 256 }
 0x151   : > { %p1845_p4 = scmp.ne.s32.totalorder %s2765_s27, %s1844_s3  ;;  %p1849_p8 = scmp.lt.u32.totalorder %s2765_s27, %s3210_s18 }
 0x152   : > { %p1850_p1 = scmp.lt.u32.totalorder %s1848_s11, %s1844_s3  ;;  %p1852_p10 = scmp.lt.u32.totalorder %s1844_s3, %s2765_s27 }
 0x153   : > { %p1846_p6 = pnand %p1845_p4, %p3211_p5 }
 0x154   : > { %p1851_p2 = por %p1850_p1, %p1849_p8 }
 0x155   : > { %p1847_p11 = pneg %p1846_p6 }
 0x156   : > { %p1853_p9 = por %p1852_p10, %p1851_p2 }
 0x158   : > { %p1854_p13 = pnand %p1853_p9, %p1847_p11 }
 0x15a   : > { %1857 = shalt.err (!%p1854_p13)
}
 0x15b   : > { %s3212_s2 = sld [smem:[#allocation57_spill]]  ;;  %s3108_s12 = scalar_lea.vmem [#allocation20], %s2690_s28 }
 0x15c   : > { %1483 = dma.vmem_to_hbm [thread:$0]  (%p3211_p5), %s938_s9, 128, %s2765_s27, %s867_s5   ;;  %844 = vst [vmem:[%s3108_s12] sm:$0xff] %v728_v34 }
 0x15d   : > { %s3213_s3 = sld [smem:[#allocation70_spill]]  ;;  %s3214_s11 = scalar_lea.vmem [#allocation23], %s2710_s22 }
 0x15e   : > { %s952_s25 = sshll.u32 %s3214_s11, 4  ;;  %s2163_s24 = smov [#allocation23]   ;;  %s953_s25 = int_to_ptr.vmem [resolvable:$true] %s952_s25 }
 0x15f   : > { %s1858_s0 = scalar_lea.vmem %s953_s25, 128  ;;  %s1862_s4 = sshll.u32 %s2163_s24, 4  ;;  %s1863_s4 = int_to_ptr.vmem [resolvable:$false] %s1862_s4 }
 0x160   : > { %p1859_p3 = scmp.ne.s32.totalorder %s953_s25, %s1858_s0  ;;  %s1864_s27 = scalar_lea.vmem %s1863_s4, 256 }
 0x161   : > { %p3215_p7 = scmp.ne.s32.totalorder %s3212_s2, 0  ;;  %p1865_p4 = scmp.lt.s32.totalorder %s953_s25, %s1863_s4 }
 0x162   : > { %p1866_p6 = scmp.lt.s32.totalorder %s1864_s27, %s1858_s0 }
 0x163   : > { %s2796_s17 = scalar_lea.hbm %s3213_s3, %s2767_s8  ;;  %p1860_p12 = pnand %p1859_p3, %p3215_p7 }
 0x164   : > { %p1867_p11 = por %p1866_p6, %p1865_p4 }
 0x165   : > { %p1861_p0 = pneg %p1860_p12 }
 0x167   : > { %p1868_p8 = pnand %p1867_p11, %p1861_p0 }
 0x169   : > { %1871 = shalt.err (!%p1868_p8)
}
 0x16a   : > { %s1872_s9 = scalar_lea.hbm %s2796_s17, 128  ;;  %s1876_s24 = scalar_lea.hbm %s3213_s3, 512 }
 0x16b   : > { %p1873_p1 = scmp.ne.s32.totalorder %s2796_s17, %s1872_s9  ;;  %p1877_p9 = scmp.lt.u32.totalorder %s2796_s17, %s3213_s3 }
 0x16c   : > { %p1878_p13 = scmp.lt.u32.totalorder %s1876_s24, %s1872_s9  ;;  %p1880_p12 = scmp.lt.u32.totalorder %s1872_s9, %s2796_s17 }
 0x16d   : > { %p1874_p2 = pnand %p1873_p1, %p3215_p7 }
 0x16e   : > { %p1879_p3 = por %p1878_p13, %p1877_p9 }
 0x16f   : > { %p1875_p10 = pneg %p1874_p2 }
 0x170   : > { %p1881_p0 = por %p1880_p12, %p1879_p3 }
 0x172   : > { %p1882_p4 = pnand %p1881_p0, %p1875_p10 }
 0x174   : > { %1885 = shalt.err (!%p1882_p4)
}
 0x175   : > { %1484 = dma.vmem_to_hbm [thread:$0]  (%p3215_p7), %s953_s25, 128, %s2796_s17, %s867_s5  }
 0x176   : > { %p709_p6 = scmp.lt.s32.totalorder %s3207_s20, 1  ;;  %s3216_s9 = sld [smem:[#allocation65_spill]] }
 0x177   : > { %s3110_s13 = scalar_lea.vmem [#allocation18], %s2710_s22  ;;  %s3217_s12 = sld [smem:[#allocation67_spill]] }
 0x178   : > { %s3253_s20 = smov (!%p709_p6, %s3207_s20), 1  ;;  %s911_s24 = sshll.u32 %s3110_s13, 4  ;;  %s2835_s24 = int_to_ptr.vmem [resolvable:$true] %s911_s24 }
 0x179   : > { %s673_s5 = scalar_lea.vmem [#allocation17], %s2710_s22  ;;  %s3220_s11 = sshll.u32 %s3206_s21, 7 }
 0x17a   : > { %s894_s17 = sshll.u32 %s673_s5, 4  ;;  %s3221_s7 = sld [smem:[#allocation68_spill]]  ;;  %s2845_s17 = int_to_ptr.vmem [resolvable:$true] %s894_s17 }
 0x17b   : > { %s3114_s15 = scalar_lea.vmem [#allocation24], %s2710_s22  ;;  %s1886_s21 = scalar_lea.vmem %s2845_s17, 128 }
 0x17c   : > { %s711_s30 = scalar_lea.vmem %s3216_s9, %s3253_s20  ;;  %s3218_s20 = scalar_lea.vmem [#allocation20], %s2690_s28 }
 0x17d   : > { %v1372_v40 = vld [vmem:[%s711_s30] ss:$0 sm:$0xff]  ;;  %s2831_s3 = scalar_lea.hbm %s3217_s12, %s2767_s8  ;;  %s924_s25 = sshll.u32 %s3218_s20, 4  ;;  %s2859_s25 = int_to_ptr.vmem [resolvable:$true] %s924_s25 }
 0x17e   : > { %s3219_s9 = sld [smem:[#allocation66_spill]]  ;;  %s2857_s28 = sshll.u32 %s3114_s15, 4  ;;  %s2895_s28 = int_to_ptr.vmem [resolvable:$true] %s2857_s28 }
 0x17f   : > { %s852_s20 = scalar_lea.sflag [#allocation8], %s2707_s10  ;;  %p1887_p11 = scmp.ne.s32.totalorder %s2845_s17, %s1886_s21 }
 0x180   : > { %s2852_s18 = scalar_lea.hbm %s3221_s7, %s3220_s11  ;;  %s2164_s13 = smov [#allocation17]  }
 0x181   : > { %p1888_p8 = pnand %p1887_p11, %p3215_p7  ;;  %s1890_s0 = sshll.u32 %s2164_s13, 4  ;;  %s1891_s0 = int_to_ptr.vmem [resolvable:$false] %s1890_s0 }
 0x182   : > { %s1892_s27 = scalar_lea.vmem %s1891_s0, 256  ;;  %p1893_p2 = scmp.lt.s32.totalorder %s2845_s17, %s1891_s0 }
 0x183   : > { %p1889_p1 = pneg %p1888_p8  ;;  %p1894_p10 = scmp.lt.s32.totalorder %s1892_s27, %s1886_s21 }
 0x184   : > { %s2843_s30 = scalar_lea.hbm %s3219_s9, %s2767_s8 }
 0x185   : > { %p1895_p9 = por %p1894_p10, %p1893_p2 }
 0x187   : > { %p1896_p13 = pnand %p1895_p9, %p1889_p1 }
 0x221   : > { %v819_v39 = vpop.f32.mrb[0].mxu0 }
 0x222   : > { %v820_v41 = vadd.f32 %v819_v39, %v2736_v16  ;;  %v1443_v42 = vpop.f32.mrb[1].mxu0 }
 0x224   : > { %v830_v43 = vadd.f32 %v1372_v40, %v820_v41 }
 0x226   : > { %vm831_vm1 = vcmp.ge.f32.partialorder %v830_v43, 0.0  ;;  %834 = vst [vmem:[%s673_s5] sm:$0xff] %v830_v43 }
 0x227   : > { %v1373_v44 = vsel %vm831_vm1, 1.0, %v2161_v1 }
 0x228   : > { %1899 = shalt.err (!%p1896_p13)
}
 0x229   : > { %s1900_s5 = scalar_lea.hbm %s2843_s30, 128  ;;  %s1904_s13 = scalar_lea.hbm %s3219_s9, 512 }
 0x22a   : > { %p1901_p3 = scmp.ne.s32.totalorder %s2843_s30, %s1900_s5  ;;  %p1905_p4 = scmp.lt.u32.totalorder %s2843_s30, %s3219_s9 }
 0x22b   : > { %p1906_p6 = scmp.lt.u32.totalorder %s1904_s13, %s1900_s5  ;;  %p1908_p8 = scmp.lt.u32.totalorder %s1900_s5, %s2843_s30 }
 0x22c   : > { %p1902_p12 = pnand %p1901_p3, %p3215_p7 }
 0x22d   : > { %p1907_p11 = por %p1906_p6, %p1905_p4 }
 0x22e   : > { %p1903_p0 = pneg %p1902_p12 }
 0x22f   : > { %p1909_p1 = por %p1908_p8, %p1907_p11 }
 0x231   : > { %p1910_p2 = pnand %p1909_p1, %p1903_p0 }
 0x233   : > { %1913 = shalt.err (!%p1910_p2)
}
 0x234   : > { %1480 = dma.vmem_to_hbm [thread:$0]  (%p3215_p7), %s2845_s17, 128, %s2843_s30, %s852_s20  }
 0x235   : > { %s3222_s15 = scalar_lea.vmem [#allocation18], %s2710_s22  ;;  %s3223_s21 = scalar_lea.vmem [#allocation24], %s2710_s22 }
 0x236   : > { %835 = vst [vmem:[%s3222_s15] sm:$0xff] %v1373_v44  ;;  %850 = vst [vmem:[%s3223_s21] sm:$0xff] %v1373_v44  ;;  %s3224_s11 = sld [smem:[#allocation71_spill]]  ;;  %s857_s13 = scalar_lea.sflag [#allocation19], %s2698_s6 }
 0x237   : > { %s1914_s0 = scalar_lea.vmem %s2835_s24, 128  ;;  %s2165_s9 = smov [#allocation18]  }
 0x238   : > { %p1915_p10 = scmp.ne.s32.totalorder %s2835_s24, %s1914_s0  ;;  %s1918_s29 = sshll.u32 %s2165_s9, 4  ;;  %s1919_s29 = int_to_ptr.vmem [resolvable:$false] %s1918_s29 }
 0x239   : > { %s1920_s17 = scalar_lea.vmem %s1919_s29, 256  ;;  %p1921_p3 = scmp.lt.s32.totalorder %s2835_s24, %s1919_s29 }
 0x23a   : > { %p1916_p9 = pnand %p1915_p10, %p3215_p7  ;;  %p1922_p12 = scmp.lt.s32.totalorder %s1920_s17, %s1914_s0 }
 0x23c   : > { %s2892_s4 = scalar_lea.hbm %s3224_s11, %s2767_s8  ;;  %p1917_p13 = pneg %p1916_p9 }
 0x23d   : > { %p1923_p0 = por %p1922_p12, %p1921_p3 }
 0x23f   : > { %p1924_p4 = pnand %p1923_p0, %p1917_p13 }
 0x241   : > { %1927 = shalt.err (!%p1924_p4)
}
 0x242   : > { %s1928_s22 = scalar_lea.hbm %s2831_s3, 128  ;;  %s1932_s9 = scalar_lea.hbm %s3217_s12, 512 }
 0x243   : > { %p1929_p6 = scmp.ne.s32.totalorder %s2831_s3, %s1928_s22  ;;  %p1933_p1 = scmp.lt.u32.totalorder %s2831_s3, %s3217_s12 }
 0x244   : > { %p1934_p2 = scmp.lt.u32.totalorder %s1932_s9, %s1928_s22  ;;  %p1936_p9 = scmp.lt.u32.totalorder %s1928_s22, %s2831_s3 }
 0x245   : > { %p1930_p11 = pnand %p1929_p6, %p3215_p7 }
 0x246   : > { %p1935_p10 = por %p1934_p2, %p1933_p1 }
 0x247   : > { %p1931_p8 = pneg %p1930_p11 }
 0x248   : > { %p1937_p13 = por %p1936_p9, %p1935_p10 }
 0x24a   : > { %p1938_p3 = pnand %p1937_p13, %p1931_p8 }
 0x24c   : > { %1941 = shalt.err (!%p1938_p3)
}
 0x24d   : > { %1481 = dma.vmem_to_hbm [thread:$0]  (%p3215_p7), %s2835_s24, 128, %s2831_s3, %s857_s13  }
 0x24e   : > { %s1942_s15 = scalar_lea.vmem %s2859_s25, 128  ;;  %s2166_s21 = smov [#allocation20]  }
 0x24f   : > { %p1943_p12 = scmp.ne.s32.totalorder %s2859_s25, %s1942_s15  ;;  %s1946_s27 = sshll.u32 %s2166_s21, 4  ;;  %s1947_s27 = int_to_ptr.vmem [resolvable:$false] %s1946_s27 }
 0x250   : > { %s1948_s5 = scalar_lea.vmem %s1947_s27, 256  ;;  %p1949_p6 = scmp.lt.s32.totalorder %s2859_s25, %s1947_s27 }
 0x251   : > { %p1944_p0 = pnand %p1943_p12, %p3211_p5  ;;  %p1950_p11 = scmp.lt.s32.totalorder %s1948_s5, %s1942_s15 }
 0x253   : > { %p1945_p4 = pneg %p1944_p0  ;;  %p1951_p8 = por %p1950_p11, %p1949_p6 }
 0x255   : > { %p1952_p1 = pnand %p1951_p8, %p1945_p4 }
 0x257   : > { %1955 = shalt.err (!%p1952_p1)
}
 0x258   : > { %s1956_s3 = scalar_lea.hbm %s2852_s18, 128  ;;  %s1960_s17 = scalar_lea.hbm %s3221_s7, 256 }
 0x259   : > { %p1957_p2 = scmp.ne.s32.totalorder %s2852_s18, %s1956_s3  ;;  %p1961_p13 = scmp.lt.u32.totalorder %s2852_s18, %s3221_s7 }
 0x25a   : > { %p1962_p3 = scmp.lt.u32.totalorder %s1960_s17, %s1956_s3  ;;  %p1964_p0 = scmp.lt.u32.totalorder %s1956_s3, %s2852_s18 }
 0x25b   : > { %p1958_p10 = pnand %p1957_p2, %p3211_p5 }
 0x25c   : > { %p1963_p12 = por %p1962_p3, %p1961_p13 }
 0x25d   : > { %p1959_p9 = pneg %p1958_p10 }
 0x25e   : > { %p1965_p4 = por %p1964_p0, %p1963_p12 }
 0x260   : > { %p1966_p6 = pnand %p1965_p4, %p1959_p9 }
 0x262   : > { %1969 = shalt.err (!%p1966_p6)
}
 0x263   : > { %1482 = dma.vmem_to_hbm [thread:$0]  (%p3211_p5), %s2859_s25, 128, %s2852_s18, %s857_s13  }
 0x264   : > { %s877_s30 = scalar_lea.sflag [#allocation25], %s2707_s10  ;;  %s1970_s9 = scalar_lea.vmem %s2895_s28, 128 }
 0x265   : > { %p1971_p11 = scmp.ne.s32.totalorder %s2895_s28, %s1970_s9  ;;  %s2167_s20 = smov [#allocation24]  }
 0x266   : > { %s1974_s29 = sshll.u32 %s2167_s20, 4  ;;  %s1975_s29 = int_to_ptr.vmem [resolvable:$false] %s1974_s29 }
 0x267   : > { %p1972_p8 = pnand %p1971_p11, %p3215_p7  ;;  %s1976_s14 = scalar_lea.vmem %s1975_s29, 256 }
 0x268   : > { %p1977_p2 = scmp.lt.s32.totalorder %s2895_s28, %s1975_s29  ;;  %p1978_p10 = scmp.lt.s32.totalorder %s1976_s14, %s1970_s9 }
 0x269   : > { %p1973_p1 = pneg %p1972_p8 }
 0x26a   : > { %p1979_p9 = por %p1978_p10, %p1977_p2 }
 0x26c   : > { %p1980_p13 = pnand %p1979_p9, %p1973_p1 }
 0x26e   : > { %1983 = shalt.err (!%p1980_p13)
}
 0x26f   : > { %s1984_s6 = scalar_lea.hbm %s2892_s4, 128  ;;  %s1988_s25 = scalar_lea.hbm %s3224_s11, 512 }
 0x270   : > { %p1985_p5 = scmp.ne.s32.totalorder %s2892_s4, %s1984_s6  ;;  %p1989_p0 = scmp.lt.u32.totalorder %s2892_s4, %s3224_s11 }
 0x271   : > { %p1990_p4 = scmp.lt.u32.totalorder %s1988_s25, %s1984_s6  ;;  %p1992_p11 = scmp.lt.u32.totalorder %s1984_s6, %s2892_s4 }
 0x272   : > { %p1986_p3 = pnand %p1985_p5, %p3215_p7 }
 0x273   : > { %p1991_p6 = por %p1990_p4, %p1989_p0 }
 0x274   : > { %p1987_p12 = pneg %p1986_p3 }
 0x275   : > { %p1993_p8 = por %p1992_p11, %p1991_p6 }
 0x277   : > { %p1994_p1 = pnand %p1993_p8, %p1987_p12 }
 0x279   : > { %1997 = shalt.err (!%p1994_p1)
}
 0x27a   : > { %1485 = dma.vmem_to_hbm [thread:$0]  (%p3215_p7), %s2895_s28, 128, %s2892_s4, %s877_s30  }
 0x27b PF: > { %s3225_s21 = sld [smem:[#allocation37_spill]]  ;;  %p1531_p2 = scmp.ge.s32.totalorder %s2148_s16, 2 }
 0x27c   : > { %p3226_p10 = scmp.ne.s32.totalorder %s3175_s19, 0 }
 0x27e   : > { %p2970_p9 = pnand %p1531_p2, %p3226_p10 }
 0x281   : > { %s979_s27 = sand.u32 1, %s3225_s21  }
 0x282   : > { %s980_s3 = scalar_lea.sflag [#allocation8], %s979_s27 }
 0x283   : > { %2071 = dma.done.wait (!%p2970_p9), %s980_s3, 128  }
 0x284   : > { %2073 = vsyncadd (!%p2970_p9), %s980_s3, 4294967168  ;;  %s3228_s2 = sadd.s32 4294967294, %s2148_s16  }
 0x285   : > { %s988_s28 = sand.u32 1, %s3228_s2  }
 0x286   : > { %s989_s4 = scalar_lea.sflag [#allocation19], %s988_s28 }
 0x287   : > { %2075 = dma.done.wait (!%p2970_p9), %s989_s4, 128  }
 0x288   : > { %2077 = vsyncadd (!%p2970_p9), %s989_s4, 4294967168  ;;  %s3229_s19 = sld [smem:[#allocation51_spill]] }
 0x28e   : > { %p3230_p7 = scmp.ne.s32.totalorder %s3229_s19, 0 }
 0x290   : > { %p1518_p13 = pnand %p1531_p2, %p3230_p7 }
 0x292   : > { %2079 = dma.done.wait (!%p1518_p13), %s989_s4, 128  }
 0x293   : > { %2081 = vsyncadd (!%p1518_p13), %s989_s4, 4294967168  ;;  %s1007_s24 = scalar_lea.sflag [#allocation22], %s988_s28 }
 0x294   : > { %2083 = dma.done.wait (!%p1518_p13), %s1007_s24, 128  }
 0x295   : > { %2085 = vsyncadd (!%p1518_p13), %s1007_s24, 4294967168 }
 0x296   : > { %2087 = dma.done.wait (!%p2970_p9), %s1007_s24, 128  }
 0x297   : > { %2089 = vsyncadd (!%p2970_p9), %s1007_s24, 4294967168  ;;  %s1025_s0 = scalar_lea.sflag [#allocation25], %s979_s27 }
 0x298   : > { %2091 = dma.done.wait (!%p2970_p9), %s1025_s0, 128  }
 0x299   : > { %2093 = vsyncadd (!%p2970_p9), %s1025_s0, 4294967168  ;;  %s47_s16 = sadd.s32 1, %s2148_s16   ;;  %s3232_s21 = sld [smem:[#allocation36_spill]] }
 0x29a   : > { %p2995_p5 = scmp.ge.s32.totalorder %s47_s16, 6   ;;  %s3233_s24 = sld [smem:[#allocation38_spill]] }
 0x29b   : > { %s3234_s8 = sld [smem:[#allocation58_spill]]  ;;  %s3235_s27 = sld [smem:[#allocation39_spill]] }
 0x29c   : > { %s3236_s28 = sld [smem:[#allocation40_spill]]  ;;  %s3237_s29 = sld [smem:[#allocation48_spill]] }
 0x29d   : > { %s3238_s30 = sld [smem:[#allocation43_spill]]  ;;  %s3239_s13 = sld [smem:[#allocation44_spill]] }
 0x29e   : > { %s3240_s14 = sld [smem:[#allocation46_spill]]  ;;  %s3241_s15 = sld [smem:[#allocation55_spill]] }
 0x29f   : > { %s3242_s22 = smov %s2104_s23  ;;  %s3243_s23 = smov %s2505_s1 }
 0x2a0   : > { %s3244_s25 = smov %s2116_s26  ;;  %46 = sbr.rel (!%p2995_p5) target bundleno = 36 (0x24), region = 246 }
 0x2a1   : > { %s3245_s26 = smov %s3234_s8 }
 0x2a7   :  { %1030 = vsyncpa [#allocation7], 1 }
 0x2a8   :  { %1032 = vsyncpa [#allocation7 + $0x1], 1 }
 0x2a9   :  { %1033 = vsyncpa [#allocation10], 1 }
 0x2aa   :  { %1035 = vsyncpa [#allocation10 + $0x1], 1 }
 0x2ab   :  { %1036 = vsyncpa [#allocation13], 1 }
 0x2ac   :  { %1038 = vsyncpa [#allocation13 + $0x1], 1 }
 0x2ad   :  { %1039 = vsyncpa [#allocation16], 1 }
 0x2ae   :  { %1041 = vsyncpa [#allocation16 + $0x1], 1 }
 0x2af   :  { %1042 = vsyncpa [#allocation8], 1 }
 0x2b0   :  { %1044 = vsyncpa [#allocation8 + $0x1], 1 }
 0x2b1   :  { %1045 = vsyncpa [#allocation19], 1 }
 0x2b2   :  { %1047 = vsyncpa [#allocation19 + $0x1], 1 }
 0x2b3   :  { %1048 = vsyncpa [#allocation22], 1 }
 0x2b4   :  { %1050 = vsyncpa [#allocation22 + $0x1], 1 }
 0x2b5   :  { %1051 = vsyncpa [#allocation25], 1 }
 0x2b6   :  { %1053 = vsyncpa [#allocation25 + $0x1], 1 }

</bundles_post_ra>
